<compile_context>
chip_gen: v6e
topology: v6e:2x2x1
jax: 0.10.0
libtpu: 0.0.40
codegen_flags: <defaults>
</compile_context>

<pallas_src>
from functools import partial  # noqa: F401  (kept for parity; not needed now)

import jax
import jax.numpy as jnp
from jax.experimental import pallas as pl
from jax.experimental.pallas import tpu as pltpu

# ----------------------------- configuration ------------------------------
BATCH = 2
IMG = 16          # input resolution
PATCH = 8         # conv1 kernel == stride (patchify)
IN_CH = 3
WIDTH = 32        # visual transformer width == ctx_dim
HEADS = 4
LAYERS = 2        # clip_model.visual.transformer.layers
N_CTX = 2         # cfg.TRAINER.VPT.N_CTX
OUT_DIM = 16      # clip_model.visual.proj output dim
MLP_RATIO = 4
EPS = 1e-5        # torch LayerNorm default

GRID_HW = IMG // PATCH
N_PATCH = GRID_HW * GRID_HW      # 4
SEQ0 = N_PATCH + 1               # cls + patches = 5
SEQ = SEQ0 + N_CTX               # per-layer seq length with prompts = 7
SEQ_PAD = 8                      # sublane-aligned token axis

VMEM = pltpu.MemorySpace.VMEM


# ------------------------------ fused kernel -------------------------------
def _encoder_kernel(xp_ref, wconv_ref, base_ref,
                    lnpre_g_ref, lnpre_b_ref,
                    ctx_ref, ctxm_ref, amask_ref,
                    ln1_g_ref, ln1_b_ref, wqkv_ref, bqkv_ref, wo_ref, bo_ref,
                    ln2_g_ref, ln2_b_ref, wfc1_ref, bfc1_ref, wfc2_ref, bfc2_ref,
                    lnpost_g_ref, lnpost_b_ref, sel_ref, proj_ref,
                    out_ref):
    f32 = jnp.float32
    hd = WIDTH // HEADS
    scale = float(hd) ** -0.5

    def layernorm(v, g, b):
        mu = jnp.mean(v, axis=-1, keepdims=True)
        var = jnp.mean((v - mu) ** 2, axis=-1, keepdims=True)
        return (v - mu) * jax.lax.rsqrt(var + EPS) * g + b

    # conv1 patch embedding (pad rows are all-zero pixels -> stay zero) and the
    # additive [class_emb | positional_embedding] base, all in (B*S_pad, D).
    x = jnp.dot(xp_ref[...], wconv_ref[...], preferred_element_type=f32)
    x = x + base_ref[...]

    # ln_pre (applied before prompts are inserted — prompt/pad rows get
    # overwritten or masked, so normalizing them here is harmless).
    x = layernorm(x, lnpre_g_ref[...], lnpre_b_ref[...])

    ctx_m = ctxm_ref[...]          # (B*S_pad, 1): 1.0 on the N_CTX prompt rows
    amask = amask_ref[...]         # (B*S_pad, B*S_pad) additive attention mask

    for l in range(LAYERS):
        # VPT-Deep prompt swap: replace the prompt rows with this layer's ctx.
        # (equivalent to x = x[:-n_ctx]; x = cat([x, ctx[l]]) in the reference)
        x = x * (1.0 - ctx_m) + ctx_ref[l] * ctx_m

        # ---- multi-head self-attention ----
        y = layernorm(x, ln1_g_ref[l], ln1_b_ref[l])
        qkv = jnp.dot(y, wqkv_ref[l], preferred_element_type=f32) + bqkv_ref[l]
        wo = wo_ref[l]
        attn_out = jnp.zeros(x.shape, f32)
        for h in range(HEADS):                       # static unroll, HEADS=4
            lo, hi = h * hd, (h + 1) * hd
            qh = qkv[:, lo:hi]
            kh = qkv[:, WIDTH + lo:WIDTH + hi]
            vh = qkv[:, 2 * WIDTH + lo:2 * WIDTH + hi]
            s = jax.lax.dot_general(qh, kh, (((1,), (1,)), ((), ())),
                                    preferred_element_type=f32)
            s = s * scale + amask                    # cross-batch + pad keys -> -inf
            s = s - jnp.max(s, axis=-1, keepdims=True)
            p = jnp.exp(s)
            p = p * pl.reciprocal(jnp.sum(p, axis=-1, keepdims=True), approx=True)
            oh = jnp.dot(p, vh, preferred_element_type=f32)
            # accumulate through the matching rows of w_out — no concatenate
            attn_out = attn_out + jnp.dot(oh, wo[lo:hi, :],
                                          preferred_element_type=f32)
        x = x + attn_out + bo_ref[l]

        # ---- MLP with QuickGELU ----
        z = layernorm(x, ln2_g_ref[l], ln2_b_ref[l])
        hdn = jnp.dot(z, wfc1_ref[l], preferred_element_type=f32) + bfc1_ref[l]
        hdn = hdn * jax.nn.sigmoid(1.702 * hdn)      # QuickGELU
        x = x + jnp.dot(hdn, wfc2_ref[l], preferred_element_type=f32) + bfc2_ref[l]

    # TODO(synk): per-layer attention weights (joint_attn) are discarded by
    # ImageEncoder_VPTD.forward (only x is used), so they are not emitted here.

    # ln_post on the class token of each batch element + ProjLearner.
    x_cls = jnp.dot(sel_ref[...], x, preferred_element_type=f32)   # (B, D)
    xn = layernorm(x_cls, lnpost_g_ref[...], lnpost_b_ref[...])
    out_ref[...] = jnp.dot(xn, proj_ref[...], preferred_element_type=f32)


# ----------------------------- parameter setup -----------------------------
def init_params(key):
    std = 0.02
    keys = jax.random.split(key, 5 + LAYERS)
    params = {
        'conv_w': jax.random.normal(keys[0], (WIDTH, IN_CH, PATCH, PATCH),
                                    jnp.float32) * std,
        'class_emb': jax.random.normal(keys[1], (WIDTH,), jnp.float32)
                     * WIDTH ** -0.5,
        'pos_emb': jax.random.normal(keys[2], (SEQ0, WIDTH), jnp.float32)
                   * WIDTH ** -0.5,
        'ln_pre_g': jnp.ones((WIDTH,), jnp.float32),
        'ln_pre_b': jnp.zeros((WIDTH,), jnp.float32),
        'ln_post_g': jnp.ones((WIDTH,), jnp.float32),
        'ln_post_b': jnp.zeros((WIDTH,), jnp.float32),
        'proj': jax.random.normal(keys[3], (WIDTH, OUT_DIM), jnp.float32)
                * WIDTH ** -0.5,
        # VPT-Deep prompt vectors: (layers, n_ctx, ctx_dim), normal std=0.02
        'ctx': jax.random.normal(keys[4], (LAYERS, N_CTX, WIDTH),
                                 jnp.float32) * std,
    }
    blocks = []
    for i in range(LAYERS):
        bk = jax.random.split(keys[5 + i], 4)
        # Linear weights stored in (in_dim, out_dim) "math" orientation.
        blocks.append({
            'ln1_g': jnp.ones((WIDTH,), jnp.float32),
            'ln1_b': jnp.zeros((WIDTH,), jnp.float32),
            'w_qkv': jax.random.normal(bk[0], (WIDTH, 3 * WIDTH),
                                       jnp.float32) * std,
            'b_qkv': jnp.zeros((3 * WIDTH,), jnp.float32),
            'w_out': jax.random.normal(bk[1], (WIDTH, WIDTH),
                                       jnp.float32) * std,
            'b_out': jnp.zeros((WIDTH,), jnp.float32),
            'ln2_g': jnp.ones((WIDTH,), jnp.float32),
            'ln2_b': jnp.zeros((WIDTH,), jnp.float32),
            'w_fc1': jax.random.normal(bk[2], (WIDTH, MLP_RATIO * WIDTH),
                                       jnp.float32) * std,
            'b_fc1': jnp.zeros((MLP_RATIO * WIDTH,), jnp.float32),
            'w_fc2': jax.random.normal(bk[3], (MLP_RATIO * WIDTH, WIDTH),
                                       jnp.float32) * std,
            'b_fc2': jnp.zeros((WIDTH,), jnp.float32),
        })
    params['blocks'] = blocks
    return params


# ------------------------------- forward pass ------------------------------
@jax.jit
def image_encoder_vptd(x_img, params):
    B = x_img.shape[0]
    BS = B * SEQ_PAD
    PPD = IN_CH * PATCH * PATCH

    # ---------- layout glue (pure XLA, tiny, done once per call) ----------
    # conv1 patchify as a padded (B*S_pad, C*P*P) matrix: patch (b,p) at row
    # b*S_pad + 1 + p; rows 0 (cls) and >= SEQ0 are zero.
    xp = x_img.reshape(B, IN_CH, GRID_HW, PATCH, GRID_HW, PATCH)
    xp = xp.transpose(0, 2, 4, 1, 3, 5).reshape(B, N_PATCH, PPD)
    xp_pad = jnp.zeros((B, SEQ_PAD, PPD), jnp.float32)
    xp_pad = xp_pad.at[:, 1:1 + N_PATCH, :].set(xp).reshape(BS, PPD)

    w_conv = params['conv_w'].reshape(WIDTH, PPD).T            # (C*P*P, D)

    # additive base: class_emb + pos_emb[0] on row 0, pos_emb[1:] on patch rows.
    base = jnp.zeros((B, SEQ_PAD, WIDTH), jnp.float32)
    base = base.at[:, 0, :].set(params['class_emb'] + params['pos_emb'][0])
    base = base.at[:, 1:SEQ0, :].set(params['pos_emb'][1:SEQ0])
    base = base.reshape(BS, WIDTH)

    # per-layer ctx tokens scattered to their rows; plus a 0/1 row mask.
    ctx_pad = jnp.zeros((LAYERS, B, SEQ_PAD, WIDTH), jnp.float32)
    ctx_pad = ctx_pad.at[:, :, SEQ0:SEQ0 + N_CTX, :].set(
        params['ctx'][:, None, :, :])
    ctx_pad = ctx_pad.reshape(LAYERS, BS, WIDTH)

    idx = jnp.arange(BS)
    pos = idx % SEQ_PAD
    ctx_mask = jnp.where((pos >= SEQ0) & (pos < SEQ0 + N_CTX),
                         1.0, 0.0).astype(jnp.float32)[:, None]

    # additive attention mask: valid iff same batch block AND key is not the
    # padded token (pos == SEQ_PAD-1 is padding since SEQ == 7).
    same_batch = (idx[:, None] // SEQ_PAD) == (idx[None, :] // SEQ_PAD)
    key_valid = (idx[None, :] % SEQ_PAD) < SEQ
    amask = jnp.where(same_batch & key_valid, 0.0, -1e30).astype(jnp.float32)

    # class-token row selector (rows b*SEQ_PAD).
    sel = jax.nn.one_hot(jnp.arange(B) * SEQ_PAD, BS, dtype=jnp.float32)

    blocks = params['blocks']

    def stack(name, shape):
        return jnp.stack([b[name] for b in blocks]).reshape((LAYERS,) + shape)

    args = (
        xp_pad, w_conv, base,
        params['ln_pre_g'].reshape(1, WIDTH), params['ln_pre_b'].reshape(1, WIDTH),
        ctx_pad, ctx_mask, amask,
        stack('ln1_g', (1, WIDTH)), stack('ln1_b', (1, WIDTH)),
        stack('w_qkv', (WIDTH, 3 * WIDTH)), stack('b_qkv', (1, 3 * WIDTH)),
        stack('w_out', (WIDTH, WIDTH)), stack('b_out', (1, WIDTH)),
        stack('ln2_g', (1, WIDTH)), stack('ln2_b', (1, WIDTH)),
        stack('w_fc1', (WIDTH, MLP_RATIO * WIDTH)),
        stack('b_fc1', (1, MLP_RATIO * WIDTH)),
        stack('w_fc2', (MLP_RATIO * WIDTH, WIDTH)), stack('b_fc2', (1, WIDTH)),
        params['ln_post_g'].reshape(1, WIDTH), params['ln_post_b'].reshape(1, WIDTH),
        sel, params['proj'],
    )

    # Everything (weights + activations) is well under 1 MiB -> single fused
    # kernel, no grid, no tiling, all operands fully resident in VMEM.
    return pl.pallas_call(
        _encoder_kernel,
        out_shape=jax.ShapeDtypeStruct((B, OUT_DIM), jnp.float32),
        in_specs=[pl.BlockSpec(memory_space=VMEM) for _ in args],
        out_specs=pl.BlockSpec(memory_space=VMEM),
    )(*args)


# ----------------------------------- main -----------------------------------
if __name__ == "__main__":
    key = jax.random.PRNGKey(0)
    pkey, xkey = jax.random.split(key)
    params = init_params(pkey)
    x = jax.random.normal(xkey, (BATCH, IN_CH, IMG, IMG), dtype=jnp.float32)

    out = image_encoder_vptd(x, params)
    out = jax.block_until_ready(out)

    assert out.shape == (BATCH, OUT_DIM), out.shape
    assert bool(jnp.all(jnp.isfinite(out)))
    print("KERNEL_OK")
</pallas_src>

<mosaic_0001>
module attributes {stable_mosaic.version = 11 : i64} {
  func.func @_encoder_kernel(%arg0: memref<16x192xf32, #tpu.memory_space<vmem>>, %arg1: memref<192x32xf32, #tpu.memory_space<vmem>>, %arg2: memref<16x32xf32, #tpu.memory_space<vmem>>, %arg3: memref<1x32xf32, #tpu.memory_space<vmem>>, %arg4: memref<1x32xf32, #tpu.memory_space<vmem>>, %arg5: memref<2x16x32xf32, #tpu.memory_space<vmem>>, %arg6: memref<16x1xf32, #tpu.memory_space<vmem>>, %arg7: memref<16x16xf32, #tpu.memory_space<vmem>>, %arg8: memref<2x1x32xf32, #tpu.memory_space<vmem>>, %arg9: memref<2x1x32xf32, #tpu.memory_space<vmem>>, %arg10: memref<2x32x96xf32, #tpu.memory_space<vmem>>, %arg11: memref<2x1x96xf32, #tpu.memory_space<vmem>>, %arg12: memref<2x32x32xf32, #tpu.memory_space<vmem>>, %arg13: memref<2x1x32xf32, #tpu.memory_space<vmem>>, %arg14: memref<2x1x32xf32, #tpu.memory_space<vmem>>, %arg15: memref<2x1x32xf32, #tpu.memory_space<vmem>>, %arg16: memref<2x32x128xf32, #tpu.memory_space<vmem>>, %arg17: memref<2x1x128xf32, #tpu.memory_space<vmem>>, %arg18: memref<2x128x32xf32, #tpu.memory_space<vmem>>, %arg19: memref<2x1x32xf32, #tpu.memory_space<vmem>>, %arg20: memref<1x32xf32, #tpu.memory_space<vmem>>, %arg21: memref<1x32xf32, #tpu.memory_space<vmem>>, %arg22: memref<2x16xf32, #tpu.memory_space<vmem>>, %arg23: memref<32x16xf32, #tpu.memory_space<vmem>>, %arg24: memref<2x16xf32, #tpu.memory_space<vmem>>) attributes {dimension_semantics = [], scalar_prefetch = 0 : i64, scratch_operands = 0 : i64, tpu.core_type = #tpu.core_type<tc>} {
    %c0 = arith.constant 0 : index
    %c0_0 = arith.constant 0 : index
    %0 = vector.load %arg0[%c0, %c0_0] : memref<16x192xf32, #tpu.memory_space<vmem>>, vector<16x192xf32>
    %c0_1 = arith.constant 0 : index
    %c0_2 = arith.constant 0 : index
    %1 = vector.load %arg1[%c0_1, %c0_2] : memref<192x32xf32, #tpu.memory_space<vmem>>, vector<192x32xf32>
    %cst = arith.constant dense<0.000000e+00> : vector<16x32xf32>
    %2 = tpu.matmul %0, %1, %cst {dimension_numbers = #tpu.dot_dimension_numbers<[1], [0], [0], [1], [0, 0, 1, 1], [], []>} : vector<16x192xf32>, vector<192x32xf32>, vector<16x32xf32> -> vector<16x32xf32>
    %c0_3 = arith.constant 0 : index
    %c0_4 = arith.constant 0 : index
    %3 = vector.load %arg2[%c0_3, %c0_4] : memref<16x32xf32, #tpu.memory_space<vmem>>, vector<16x32xf32>
    %4 = arith.addf %2, %3 : vector<16x32xf32>
    %c0_5 = arith.constant 0 : index
    %c0_6 = arith.constant 0 : index
    %5 = vector.load %arg3[%c0_5, %c0_6] : memref<1x32xf32, #tpu.memory_space<vmem>>, vector<1x32xf32>
    %c0_7 = arith.constant 0 : index
    %c0_8 = arith.constant 0 : index
    %6 = vector.load %arg4[%c0_7, %c0_8] : memref<1x32xf32, #tpu.memory_space<vmem>>, vector<1x32xf32>
    %cst_9 = arith.constant dense<0.000000e+00> : vector<16xf32>
    %7 = vector.multi_reduction <add>, %4, %cst_9 [1] : vector<16x32xf32> to vector<16xf32>
    %8 = vector.shape_cast %7 : vector<16xf32> to vector<16x1xf32>
    %cst_10 = arith.constant 3.200000e+01 : f32
    %9 = vector.broadcast %cst_10 : f32 to vector<16x1xf32>
    %10 = arith.divf %8, %9 : vector<16x1xf32>
    %11 = vector.broadcast %10 : vector<16x1xf32> to vector<16x32xf32>
    %12 = arith.subf %4, %11 : vector<16x32xf32>
    %13 = arith.mulf %12, %12 : vector<16x32xf32>
    %cst_11 = arith.constant dense<0.000000e+00> : vector<16xf32>
    %14 = vector.multi_reduction <add>, %13, %cst_11 [1] : vector<16x32xf32> to vector<16xf32>
    %15 = vector.shape_cast %14 : vector<16xf32> to vector<16x1xf32>
    %cst_12 = arith.constant 3.200000e+01 : f32
    %16 = vector.broadcast %cst_12 : f32 to vector<16x1xf32>
    %17 = arith.divf %15, %16 : vector<16x1xf32>
    %18 = vector.broadcast %10 : vector<16x1xf32> to vector<16x32xf32>
    %19 = arith.subf %4, %18 : vector<16x32xf32>
    %cst_13 = arith.constant 9.99999974E-6 : f32
    %20 = vector.broadcast %cst_13 : f32 to vector<16x1xf32>
    %21 = arith.addf %17, %20 : vector<16x1xf32>
    %22 = math.rsqrt %21 : vector<16x1xf32>
    %23 = vector.broadcast %22 : vector<16x1xf32> to vector<16x32xf32>
    %24 = arith.mulf %19, %23 : vector<16x32xf32>
    %25 = vector.broadcast %5 : vector<1x32xf32> to vector<16x32xf32>
    %26 = arith.mulf %24, %25 : vector<16x32xf32>
    %27 = vector.broadcast %6 : vector<1x32xf32> to vector<16x32xf32>
    %28 = arith.addf %26, %27 : vector<16x32xf32>
    %c0_14 = arith.constant 0 : index
    %c0_15 = arith.constant 0 : index
    %29 = vector.load %arg6[%c0_14, %c0_15] : memref<16x1xf32, #tpu.memory_space<vmem>>, vector<16x1xf32>
    %c0_16 = arith.constant 0 : index
    %c0_17 = arith.constant 0 : index
    %30 = vector.load %arg7[%c0_16, %c0_17] : memref<16x16xf32, #tpu.memory_space<vmem>>, vector<16x16xf32>
    %cst_18 = arith.constant 1.000000e+00 : f32
    %31 = vector.broadcast %cst_18 : f32 to vector<16x1xf32>
    %32 = arith.subf %31, %29 : vector<16x1xf32>
    %33 = vector.broadcast %32 : vector<16x1xf32> to vector<16x32xf32>
    %34 = arith.mulf %28, %33 : vector<16x32xf32>
    %c0_19 = arith.constant 0 : index
    %c0_20 = arith.constant 0 : index
    %c0_21 = arith.constant 0 : index
    %35 = vector.load %arg5[%c0_19, %c0_20, %c0_21] : memref<2x16x32xf32, #tpu.memory_space<vmem>>, vector<1x16x32xf32>
    %36 = vector.shape_cast %35 : vector<1x16x32xf32> to vector<16x32xf32>
    %37 = vector.broadcast %29 : vector<16x1xf32> to vector<16x32xf32>
    %38 = arith.mulf %36, %37 : vector<16x32xf32>
    %39 = arith.addf %34, %38 : vector<16x32xf32>
    %c0_22 = arith.constant 0 : index
    %c0_23 = arith.constant 0 : index
    %c0_24 = arith.constant 0 : index
    %40 = vector.load %arg8[%c0_22, %c0_23, %c0_24] : memref<2x1x32xf32, #tpu.memory_space<vmem>>, vector<1x1x32xf32>
    %41 = vector.shape_cast %40 : vector<1x1x32xf32> to vector<1x32xf32>
    %c0_25 = arith.constant 0 : index
    %c0_26 = arith.constant 0 : index
    %c0_27 = arith.constant 0 : index
    %42 = vector.load %arg9[%c0_25, %c0_26, %c0_27] : memref<2x1x32xf32, #tpu.memory_space<vmem>>, vector<1x1x32xf32>
    %43 = vector.shape_cast %42 : vector<1x1x32xf32> to vector<1x32xf32>
    %cst_28 = arith.constant dense<0.000000e+00> : vector<16xf32>
    %44 = vector.multi_reduction <add>, %39, %cst_28 [1] : vector<16x32xf32> to vector<16xf32>
    %45 = vector.shape_cast %44 : vector<16xf32> to vector<16x1xf32>
    %cst_29 = arith.constant 3.200000e+01 : f32
    %46 = vector.broadcast %cst_29 : f32 to vector<16x1xf32>
    %47 = arith.divf %45, %46 : vector<16x1xf32>
    %48 = vector.broadcast %47 : vector<16x1xf32> to vector<16x32xf32>
    %49 = arith.subf %39, %48 : vector<16x32xf32>
    %50 = arith.mulf %49, %49 : vector<16x32xf32>
    %cst_30 = arith.constant dense<0.000000e+00> : vector<16xf32>
    %51 = vector.multi_reduction <add>, %50, %cst_30 [1] : vector<16x32xf32> to vector<16xf32>
    %52 = vector.shape_cast %51 : vector<16xf32> to vector<16x1xf32>
    %cst_31 = arith.constant 3.200000e+01 : f32
    %53 = vector.broadcast %cst_31 : f32 to vector<16x1xf32>
    %54 = arith.divf %52, %53 : vector<16x1xf32>
    %55 = vector.broadcast %47 : vector<16x1xf32> to vector<16x32xf32>
    %56 = arith.subf %39, %55 : vector<16x32xf32>
    %cst_32 = arith.constant 9.99999974E-6 : f32
    %57 = vector.broadcast %cst_32 : f32 to vector<16x1xf32>
    %58 = arith.addf %54, %57 : vector<16x1xf32>
    %59 = math.rsqrt %58 : vector<16x1xf32>
    %60 = vector.broadcast %59 : vector<16x1xf32> to vector<16x32xf32>
    %61 = arith.mulf %56, %60 : vector<16x32xf32>
    %62 = vector.broadcast %41 : vector<1x32xf32> to vector<16x32xf32>
    %63 = arith.mulf %61, %62 : vector<16x32xf32>
    %64 = vector.broadcast %43 : vector<1x32xf32> to vector<16x32xf32>
    %65 = arith.addf %63, %64 : vector<16x32xf32>
    %c0_33 = arith.constant 0 : index
    %c0_34 = arith.constant 0 : index
    %c0_35 = arith.constant 0 : index
    %66 = vector.load %arg10[%c0_33, %c0_34, %c0_35] : memref<2x32x96xf32, #tpu.memory_space<vmem>>, vector<1x32x96xf32>
    %67 = vector.shape_cast %66 : vector<1x32x96xf32> to vector<32x96xf32>
    %cst_36 = arith.constant dense<0.000000e+00> : vector<16x96xf32>
    %68 = tpu.matmul %65, %67, %cst_36 {dimension_numbers = #tpu.dot_dimension_numbers<[1], [0], [0], [1], [0, 0, 1, 1], [], []>} : vector<16x32xf32>, vector<32x96xf32>, vector<16x96xf32> -> vector<16x96xf32>
    %c0_37 = arith.constant 0 : index
    %c0_38 = arith.constant 0 : index
    %c0_39 = arith.constant 0 : index
    %69 = vector.load %arg11[%c0_37, %c0_38, %c0_39] : memref<2x1x96xf32, #tpu.memory_space<vmem>>, vector<1x1x96xf32>
    %70 = vector.shape_cast %69 : vector<1x1x96xf32> to vector<1x96xf32>
    %71 = vector.broadcast %70 : vector<1x96xf32> to vector<16x96xf32>
    %72 = arith.addf %68, %71 : vector<16x96xf32>
    %c0_40 = arith.constant 0 : index
    %c0_41 = arith.constant 0 : index
    %c0_42 = arith.constant 0 : index
    %73 = vector.load %arg12[%c0_40, %c0_41, %c0_42] : memref<2x32x32xf32, #tpu.memory_space<vmem>>, vector<1x32x32xf32>
    %74 = vector.shape_cast %73 : vector<1x32x32xf32> to vector<32x32xf32>
    %cst_43 = arith.constant 0.000000e+00 : f32
    %75 = vector.broadcast %cst_43 : f32 to vector<16x32xf32>
    %76 = vector.extract_strided_slice %72 {offsets = [0, 0], sizes = [16, 8], strides = [1, 1]} : vector<16x96xf32> to vector<16x8xf32>
    %77 = vector.extract_strided_slice %72 {offsets = [0, 32], sizes = [16, 8], strides = [1, 1]} : vector<16x96xf32> to vector<16x8xf32>
    %78 = vector.extract_strided_slice %72 {offsets = [0, 64], sizes = [16, 8], strides = [1, 1]} : vector<16x96xf32> to vector<16x8xf32>
    %cst_44 = arith.constant dense<0.000000e+00> : vector<16x16xf32>
    %79 = tpu.matmul %76, %77, %cst_44 {dimension_numbers = #tpu.dot_dimension_numbers<[1], [1], [0], [0], [0, 0, 1, 0], [], []>} : vector<16x8xf32>, vector<16x8xf32>, vector<16x16xf32> -> vector<16x16xf32>
    %cst_45 = arith.constant 0.353553385 : f32
    %80 = vector.broadcast %cst_45 : f32 to vector<16x16xf32>
    %81 = arith.mulf %79, %80 : vector<16x16xf32>
    %82 = arith.addf %81, %30 : vector<16x16xf32>
    %cst_46 = arith.constant dense<0xFF800000> : vector<16xf32>
    %83 = vector.multi_reduction <maximumf>, %82, %cst_46 [1] : vector<16x16xf32> to vector<16xf32>
    %84 = vector.shape_cast %83 : vector<16xf32> to vector<16x1xf32>
    %85 = vector.broadcast %84 : vector<16x1xf32> to vector<16x16xf32>
    %86 = arith.subf %82, %85 : vector<16x16xf32>
    %87 = math.exp %86 : vector<16x16xf32>
    %cst_47 = arith.constant dense<0.000000e+00> : vector<16xf32>
    %88 = vector.multi_reduction <add>, %87, %cst_47 [1] : vector<16x16xf32> to vector<16xf32>
    %89 = vector.shape_cast %88 : vector<16xf32> to vector<16x1xf32>
    %90 = tpu.reciprocal %89 {approx = true} : vector<16x1xf32> -> vector<16x1xf32>
    %91 = vector.broadcast %90 : vector<16x1xf32> to vector<16x16xf32>
    %92 = arith.mulf %87, %91 : vector<16x16xf32>
    %cst_48 = arith.constant dense<0.000000e+00> : vector<16x8xf32>
    %93 = tpu.matmul %92, %78, %cst_48 {dimension_numbers = #tpu.dot_dimension_numbers<[1], [0], [0], [1], [0, 0, 1, 1], [], []>} : vector<16x16xf32>, vector<16x8xf32>, vector<16x8xf32> -> vector<16x8xf32>
    %94 = vector.extract_strided_slice %74 {offsets = [0, 0], sizes = [8, 32], strides = [1, 1]} : vector<32x32xf32> to vector<8x32xf32>
    %cst_49 = arith.constant dense<0.000000e+00> : vector<16x32xf32>
    %95 = tpu.matmul %93, %94, %cst_49 {dimension_numbers = #tpu.dot_dimension_numbers<[1], [0], [0], [1], [0, 0, 1, 1], [], []>} : vector<16x8xf32>, vector<8x32xf32>, vector<16x32xf32> -> vector<16x32xf32>
    %96 = arith.addf %75, %95 : vector<16x32xf32>
    %97 = vector.extract_strided_slice %72 {offsets = [0, 8], sizes = [16, 8], strides = [1, 1]} : vector<16x96xf32> to vector<16x8xf32>
    %98 = vector.extract_strided_slice %72 {offsets = [0, 40], sizes = [16, 8], strides = [1, 1]} : vector<16x96xf32> to vector<16x8xf32>
    %99 = vector.extract_strided_slice %72 {offsets = [0, 72], sizes = [16, 8], strides = [1, 1]} : vector<16x96xf32> to vector<16x8xf32>
    %cst_50 = arith.constant dense<0.000000e+00> : vector<16x16xf32>
    %100 = tpu.matmul %97, %98, %cst_50 {dimension_numbers = #tpu.dot_dimension_numbers<[1], [1], [0], [0], [0, 0, 1, 0], [], []>} : vector<16x8xf32>, vector<16x8xf32>, vector<16x16xf32> -> vector<16x16xf32>
    %cst_51 = arith.constant 0.353553385 : f32
    %101 = vector.broadcast %cst_51 : f32 to vector<16x16xf32>
    %102 = arith.mulf %100, %101 : vector<16x16xf32>
    %103 = arith.addf %102, %30 : vector<16x16xf32>
    %cst_52 = arith.constant dense<0xFF800000> : vector<16xf32>
    %104 = vector.multi_reduction <maximumf>, %103, %cst_52 [1] : vector<16x16xf32> to vector<16xf32>
    %105 = vector.shape_cast %104 : vector<16xf32> to vector<16x1xf32>
    %106 = vector.broadcast %105 : vector<16x1xf32> to vector<16x16xf32>
    %107 = arith.subf %103, %106 : vector<16x16xf32>
    %108 = math.exp %107 : vector<16x16xf32>
    %cst_53 = arith.constant dense<0.000000e+00> : vector<16xf32>
    %109 = vector.multi_reduction <add>, %108, %cst_53 [1] : vector<16x16xf32> to vector<16xf32>
    %110 = vector.shape_cast %109 : vector<16xf32> to vector<16x1xf32>
    %111 = tpu.reciprocal %110 {approx = true} : vector<16x1xf32> -> vector<16x1xf32>
    %112 = vector.broadcast %111 : vector<16x1xf32> to vector<16x16xf32>
    %113 = arith.mulf %108, %112 : vector<16x16xf32>
    %cst_54 = arith.constant dense<0.000000e+00> : vector<16x8xf32>
    %114 = tpu.matmul %113, %99, %cst_54 {dimension_numbers = #tpu.dot_dimension_numbers<[1], [0], [0], [1], [0, 0, 1, 1], [], []>} : vector<16x16xf32>, vector<16x8xf32>, vector<16x8xf32> -> vector<16x8xf32>
    %115 = vector.extract_strided_slice %74 {offsets = [8, 0], sizes = [8, 32], strides = [1, 1]} : vector<32x32xf32> to vector<8x32xf32>
    %cst_55 = arith.constant dense<0.000000e+00> : vector<16x32xf32>
    %116 = tpu.matmul %114, %115, %cst_55 {dimension_numbers = #tpu.dot_dimension_numbers<[1], [0], [0], [1], [0, 0, 1, 1], [], []>} : vector<16x8xf32>, vector<8x32xf32>, vector<16x32xf32> -> vector<16x32xf32>
    %117 = arith.addf %96, %116 : vector<16x32xf32>
    %118 = vector.extract_strided_slice %72 {offsets = [0, 16], sizes = [16, 8], strides = [1, 1]} : vector<16x96xf32> to vector<16x8xf32>
    %119 = vector.extract_strided_slice %72 {offsets = [0, 48], sizes = [16, 8], strides = [1, 1]} : vector<16x96xf32> to vector<16x8xf32>
    %120 = vector.extract_strided_slice %72 {offsets = [0, 80], sizes = [16, 8], strides = [1, 1]} : vector<16x96xf32> to vector<16x8xf32>
    %cst_56 = arith.constant dense<0.000000e+00> : vector<16x16xf32>
    %121 = tpu.matmul %118, %119, %cst_56 {dimension_numbers = #tpu.dot_dimension_numbers<[1], [1], [0], [0], [0, 0, 1, 0], [], []>} : vector<16x8xf32>, vector<16x8xf32>, vector<16x16xf32> -> vector<16x16xf32>
    %cst_57 = arith.constant 0.353553385 : f32
    %122 = vector.broadcast %cst_57 : f32 to vector<16x16xf32>
    %123 = arith.mulf %121, %122 : vector<16x16xf32>
    %124 = arith.addf %123, %30 : vector<16x16xf32>
    %cst_58 = arith.constant dense<0xFF800000> : vector<16xf32>
    %125 = vector.multi_reduction <maximumf>, %124, %cst_58 [1] : vector<16x16xf32> to vector<16xf32>
    %126 = vector.shape_cast %125 : vector<16xf32> to vector<16x1xf32>
    %127 = vector.broadcast %126 : vector<16x1xf32> to vector<16x16xf32>
    %128 = arith.subf %124, %127 : vector<16x16xf32>
    %129 = math.exp %128 : vector<16x16xf32>
    %cst_59 = arith.constant dense<0.000000e+00> : vector<16xf32>
    %130 = vector.multi_reduction <add>, %129, %cst_59 [1] : vector<16x16xf32> to vector<16xf32>
    %131 = vector.shape_cast %130 : vector<16xf32> to vector<16x1xf32>
    %132 = tpu.reciprocal %131 {approx = true} : vector<16x1xf32> -> vector<16x1xf32>
    %133 = vector.broadcast %132 : vector<16x1xf32> to vector<16x16xf32>
    %134 = arith.mulf %129, %133 : vector<16x16xf32>
    %cst_60 = arith.constant dense<0.000000e+00> : vector<16x8xf32>
    %135 = tpu.matmul %134, %120, %cst_60 {dimension_numbers = #tpu.dot_dimension_numbers<[1], [0], [0], [1], [0, 0, 1, 1], [], []>} : vector<16x16xf32>, vector<16x8xf32>, vector<16x8xf32> -> vector<16x8xf32>
    %136 = vector.extract_strided_slice %74 {offsets = [16, 0], sizes = [8, 32], strides = [1, 1]} : vector<32x32xf32> to vector<8x32xf32>
    %cst_61 = arith.constant dense<0.000000e+00> : vector<16x32xf32>
    %137 = tpu.matmul %135, %136, %cst_61 {dimension_numbers = #tpu.dot_dimension_numbers<[1], [0], [0], [1], [0, 0, 1, 1], [], []>} : vector<16x8xf32>, vector<8x32xf32>, vector<16x32xf32> -> vector<16x32xf32>
    %138 = arith.addf %117, %137 : vector<16x32xf32>
    %139 = vector.extract_strided_slice %72 {offsets = [0, 24], sizes = [16, 8], strides = [1, 1]} : vector<16x96xf32> to vector<16x8xf32>
    %140 = vector.extract_strided_slice %72 {offsets = [0, 56], sizes = [16, 8], strides = [1, 1]} : vector<16x96xf32> to vector<16x8xf32>
    %141 = vector.extract_strided_slice %72 {offsets = [0, 88], sizes = [16, 8], strides = [1, 1]} : vector<16x96xf32> to vector<16x8xf32>
    %cst_62 = arith.constant dense<0.000000e+00> : vector<16x16xf32>
    %142 = tpu.matmul %139, %140, %cst_62 {dimension_numbers = #tpu.dot_dimension_numbers<[1], [1], [0], [0], [0, 0, 1, 0], [], []>} : vector<16x8xf32>, vector<16x8xf32>, vector<16x16xf32> -> vector<16x16xf32>
    %cst_63 = arith.constant 0.353553385 : f32
    %143 = vector.broadcast %cst_63 : f32 to vector<16x16xf32>
    %144 = arith.mulf %142, %143 : vector<16x16xf32>
    %145 = arith.addf %144, %30 : vector<16x16xf32>
    %cst_64 = arith.constant dense<0xFF800000> : vector<16xf32>
    %146 = vector.multi_reduction <maximumf>, %145, %cst_64 [1] : vector<16x16xf32> to vector<16xf32>
    %147 = vector.shape_cast %146 : vector<16xf32> to vector<16x1xf32>
    %148 = vector.broadcast %147 : vector<16x1xf32> to vector<16x16xf32>
    %149 = arith.subf %145, %148 : vector<16x16xf32>
    %150 = math.exp %149 : vector<16x16xf32>
    %cst_65 = arith.constant dense<0.000000e+00> : vector<16xf32>
    %151 = vector.multi_reduction <add>, %150, %cst_65 [1] : vector<16x16xf32> to vector<16xf32>
    %152 = vector.shape_cast %151 : vector<16xf32> to vector<16x1xf32>
    %153 = tpu.reciprocal %152 {approx = true} : vector<16x1xf32> -> vector<16x1xf32>
    %154 = vector.broadcast %153 : vector<16x1xf32> to vector<16x16xf32>
    %155 = arith.mulf %150, %154 : vector<16x16xf32>
    %cst_66 = arith.constant dense<0.000000e+00> : vector<16x8xf32>
    %156 = tpu.matmul %155, %141, %cst_66 {dimension_numbers = #tpu.dot_dimension_numbers<[1], [0], [0], [1], [0, 0, 1, 1], [], []>} : vector<16x16xf32>, vector<16x8xf32>, vector<16x8xf32> -> vector<16x8xf32>
    %157 = vector.extract_strided_slice %74 {offsets = [24, 0], sizes = [8, 32], strides = [1, 1]} : vector<32x32xf32> to vector<8x32xf32>
    %cst_67 = arith.constant dense<0.000000e+00> : vector<16x32xf32>
    %158 = tpu.matmul %156, %157, %cst_67 {dimension_numbers = #tpu.dot_dimension_numbers<[1], [0], [0], [1], [0, 0, 1, 1], [], []>} : vector<16x8xf32>, vector<8x32xf32>, vector<16x32xf32> -> vector<16x32xf32>
    %159 = arith.addf %138, %158 : vector<16x32xf32>
    %160 = arith.addf %39, %159 : vector<16x32xf32>
    %c0_68 = arith.constant 0 : index
    %c0_69 = arith.constant 0 : index
    %c0_70 = arith.constant 0 : index
    %161 = vector.load %arg13[%c0_68, %c0_69, %c0_70] : memref<2x1x32xf32, #tpu.memory_space<vmem>>, vector<1x1x32xf32>
    %162 = vector.shape_cast %161 : vector<1x1x32xf32> to vector<1x32xf32>
    %163 = vector.broadcast %162 : vector<1x32xf32> to vector<16x32xf32>
    %164 = arith.addf %160, %163 : vector<16x32xf32>
    %c0_71 = arith.constant 0 : index
    %c0_72 = arith.constant 0 : index
    %c0_73 = arith.constant 0 : index
    %165 = vector.load %arg14[%c0_71, %c0_72, %c0_73] : memref<2x1x32xf32, #tpu.memory_space<vmem>>, vector<1x1x32xf32>
    %166 = vector.shape_cast %165 : vector<1x1x32xf32> to vector<1x32xf32>
    %c0_74 = arith.constant 0 : index
    %c0_75 = arith.constant 0 : index
    %c0_76 = arith.constant 0 : index
    %167 = vector.load %arg15[%c0_74, %c0_75, %c0_76] : memref<2x1x32xf32, #tpu.memory_space<vmem>>, vector<1x1x32xf32>
    %168 = vector.shape_cast %167 : vector<1x1x32xf32> to vector<1x32xf32>
    %cst_77 = arith.constant dense<0.000000e+00> : vector<16xf32>
    %169 = vector.multi_reduction <add>, %164, %cst_77 [1] : vector<16x32xf32> to vector<16xf32>
    %170 = vector.shape_cast %169 : vector<16xf32> to vector<16x1xf32>
    %cst_78 = arith.constant 3.200000e+01 : f32
    %171 = vector.broadcast %cst_78 : f32 to vector<16x1xf32>
    %172 = arith.divf %170, %171 : vector<16x1xf32>
    %173 = vector.broadcast %172 : vector<16x1xf32> to vector<16x32xf32>
    %174 = arith.subf %164, %173 : vector<16x32xf32>
    %175 = arith.mulf %174, %174 : vector<16x32xf32>
    %cst_79 = arith.constant dense<0.000000e+00> : vector<16xf32>
    %176 = vector.multi_reduction <add>, %175, %cst_79 [1] : vector<16x32xf32> to vector<16xf32>
    %177 = vector.shape_cast %176 : vector<16xf32> to vector<16x1xf32>
    %cst_80 = arith.constant 3.200000e+01 : f32
    %178 = vector.broadcast %cst_80 : f32 to vector<16x1xf32>
    %179 = arith.divf %177, %178 : vector<16x1xf32>
    %180 = vector.broadcast %172 : vector<16x1xf32> to vector<16x32xf32>
    %181 = arith.subf %164, %180 : vector<16x32xf32>
    %cst_81 = arith.constant 9.99999974E-6 : f32
    %182 = vector.broadcast %cst_81 : f32 to vector<16x1xf32>
    %183 = arith.addf %179, %182 : vector<16x1xf32>
    %184 = math.rsqrt %183 : vector<16x1xf32>
    %185 = vector.broadcast %184 : vector<16x1xf32> to vector<16x32xf32>
    %186 = arith.mulf %181, %185 : vector<16x32xf32>
    %187 = vector.broadcast %166 : vector<1x32xf32> to vector<16x32xf32>
    %188 = arith.mulf %186, %187 : vector<16x32xf32>
    %189 = vector.broadcast %168 : vector<1x32xf32> to vector<16x32xf32>
    %190 = arith.addf %188, %189 : vector<16x32xf32>
    %c0_82 = arith.constant 0 : index
    %c0_83 = arith.constant 0 : index
    %c0_84 = arith.constant 0 : index
    %191 = vector.load %arg16[%c0_82, %c0_83, %c0_84] : memref<2x32x128xf32, #tpu.memory_space<vmem>>, vector<1x32x128xf32>
    %192 = vector.shape_cast %191 : vector<1x32x128xf32> to vector<32x128xf32>
    %cst_85 = arith.constant dense<0.000000e+00> : vector<16x128xf32>
    %193 = tpu.matmul %190, %192, %cst_85 {dimension_numbers = #tpu.dot_dimension_numbers<[1], [0], [0], [1], [0, 0, 1, 1], [], []>} : vector<16x32xf32>, vector<32x128xf32>, vector<16x128xf32> -> vector<16x128xf32>
    %c0_86 = arith.constant 0 : index
    %c0_87 = arith.constant 0 : index
    %c0_88 = arith.constant 0 : index
    %194 = vector.load %arg17[%c0_86, %c0_87, %c0_88] : memref<2x1x128xf32, #tpu.memory_space<vmem>>, vector<1x1x128xf32>
    %195 = vector.shape_cast %194 : vector<1x1x128xf32> to vector<1x128xf32>
    %196 = vector.broadcast %195 : vector<1x128xf32> to vector<16x128xf32>
    %197 = arith.addf %193, %196 : vector<16x128xf32>
    %cst_89 = arith.constant 1.702000e+00 : f32
    %198 = vector.broadcast %cst_89 : f32 to vector<16x128xf32>
    %199 = arith.mulf %198, %197 : vector<16x128xf32>
    %200 = arith.negf %199 : vector<16x128xf32>
    %201 = math.exp %200 : vector<16x128xf32>
    %cst_90 = arith.constant 1.000000e+00 : f32
    %202 = vector.broadcast %cst_90 : f32 to vector<16x128xf32>
    %203 = arith.addf %202, %201 : vector<16x128xf32>
    %204 = arith.divf %202, %203 : vector<16x128xf32>
    %205 = arith.mulf %197, %204 : vector<16x128xf32>
    %c0_91 = arith.constant 0 : index
    %c0_92 = arith.constant 0 : index
    %c0_93 = arith.constant 0 : index
    %206 = vector.load %arg18[%c0_91, %c0_92, %c0_93] : memref<2x128x32xf32, #tpu.memory_space<vmem>>, vector<1x128x32xf32>
    %207 = vector.shape_cast %206 : vector<1x128x32xf32> to vector<128x32xf32>
    %cst_94 = arith.constant dense<0.000000e+00> : vector<16x32xf32>
    %208 = tpu.matmul %205, %207, %cst_94 {dimension_numbers = #tpu.dot_dimension_numbers<[1], [0], [0], [1], [0, 0, 1, 1], [], []>} : vector<16x128xf32>, vector<128x32xf32>, vector<16x32xf32> -> vector<16x32xf32>
    %209 = arith.addf %164, %208 : vector<16x32xf32>
    %c0_95 = arith.constant 0 : index
    %c0_96 = arith.constant 0 : index
    %c0_97 = arith.constant 0 : index
    %210 = vector.load %arg19[%c0_95, %c0_96, %c0_97] : memref<2x1x32xf32, #tpu.memory_space<vmem>>, vector<1x1x32xf32>
    %211 = vector.shape_cast %210 : vector<1x1x32xf32> to vector<1x32xf32>
    %212 = vector.broadcast %211 : vector<1x32xf32> to vector<16x32xf32>
    %213 = arith.addf %209, %212 : vector<16x32xf32>
    %cst_98 = arith.constant 1.000000e+00 : f32
    %214 = vector.broadcast %cst_98 : f32 to vector<16x1xf32>
    %215 = arith.subf %214, %29 : vector<16x1xf32>
    %216 = vector.broadcast %215 : vector<16x1xf32> to vector<16x32xf32>
    %217 = arith.mulf %213, %216 : vector<16x32xf32>
    %c1 = arith.constant 1 : index
    %c0_99 = arith.constant 0 : index
    %c0_100 = arith.constant 0 : index
    %218 = vector.load %arg5[%c1, %c0_99, %c0_100] : memref<2x16x32xf32, #tpu.memory_space<vmem>>, vector<1x16x32xf32>
    %219 = vector.shape_cast %218 : vector<1x16x32xf32> to vector<16x32xf32>
    %220 = vector.broadcast %29 : vector<16x1xf32> to vector<16x32xf32>
    %221 = arith.mulf %219, %220 : vector<16x32xf32>
    %222 = arith.addf %217, %221 : vector<16x32xf32>
    %c1_101 = arith.constant 1 : index
    %c0_102 = arith.constant 0 : index
    %c0_103 = arith.constant 0 : index
    %223 = vector.load %arg8[%c1_101, %c0_102, %c0_103] : memref<2x1x32xf32, #tpu.memory_space<vmem>>, vector<1x1x32xf32>
    %224 = vector.shape_cast %223 : vector<1x1x32xf32> to vector<1x32xf32>
    %c1_104 = arith.constant 1 : index
    %c0_105 = arith.constant 0 : index
    %c0_106 = arith.constant 0 : index
    %225 = vector.load %arg9[%c1_104, %c0_105, %c0_106] : memref<2x1x32xf32, #tpu.memory_space<vmem>>, vector<1x1x32xf32>
    %226 = vector.shape_cast %225 : vector<1x1x32xf32> to vector<1x32xf32>
    %cst_107 = arith.constant dense<0.000000e+00> : vector<16xf32>
    %227 = vector.multi_reduction <add>, %222, %cst_107 [1] : vector<16x32xf32> to vector<16xf32>
    %228 = vector.shape_cast %227 : vector<16xf32> to vector<16x1xf32>
    %cst_108 = arith.constant 3.200000e+01 : f32
    %229 = vector.broadcast %cst_108 : f32 to vector<16x1xf32>
    %230 = arith.divf %228, %229 : vector<16x1xf32>
    %231 = vector.broadcast %230 : vector<16x1xf32> to vector<16x32xf32>
    %232 = arith.subf %222, %231 : vector<16x32xf32>
    %233 = arith.mulf %232, %232 : vector<16x32xf32>
    %cst_109 = arith.constant dense<0.000000e+00> : vector<16xf32>
    %234 = vector.multi_reduction <add>, %233, %cst_109 [1] : vector<16x32xf32> to vector<16xf32>
    %235 = vector.shape_cast %234 : vector<16xf32> to vector<16x1xf32>
    %cst_110 = arith.constant 3.200000e+01 : f32
    %236 = vector.broadcast %cst_110 : f32 to vector<16x1xf32>
    %237 = arith.divf %235, %236 : vector<16x1xf32>
    %238 = vector.broadcast %230 : vector<16x1xf32> to vector<16x32xf32>
    %239 = arith.subf %222, %238 : vector<16x32xf32>
    %cst_111 = arith.constant 9.99999974E-6 : f32
    %240 = vector.broadcast %cst_111 : f32 to vector<16x1xf32>
    %241 = arith.addf %237, %240 : vector<16x1xf32>
    %242 = math.rsqrt %241 : vector<16x1xf32>
    %243 = vector.broadcast %242 : vector<16x1xf32> to vector<16x32xf32>
    %244 = arith.mulf %239, %243 : vector<16x32xf32>
    %245 = vector.broadcast %224 : vector<1x32xf32> to vector<16x32xf32>
    %246 = arith.mulf %244, %245 : vector<16x32xf32>
    %247 = vector.broadcast %226 : vector<1x32xf32> to vector<16x32xf32>
    %248 = arith.addf %246, %247 : vector<16x32xf32>
    %c1_112 = arith.constant 1 : index
    %c0_113 = arith.constant 0 : index
    %c0_114 = arith.constant 0 : index
    %249 = vector.load %arg10[%c1_112, %c0_113, %c0_114] : memref<2x32x96xf32, #tpu.memory_space<vmem>>, vector<1x32x96xf32>
    %250 = vector.shape_cast %249 : vector<1x32x96xf32> to vector<32x96xf32>
    %cst_115 = arith.constant dense<0.000000e+00> : vector<16x96xf32>
    %251 = tpu.matmul %248, %250, %cst_115 {dimension_numbers = #tpu.dot_dimension_numbers<[1], [0], [0], [1], [0, 0, 1, 1], [], []>} : vector<16x32xf32>, vector<32x96xf32>, vector<16x96xf32> -> vector<16x96xf32>
    %c1_116 = arith.constant 1 : index
    %c0_117 = arith.constant 0 : index
    %c0_118 = arith.constant 0 : index
    %252 = vector.load %arg11[%c1_116, %c0_117, %c0_118] : memref<2x1x96xf32, #tpu.memory_space<vmem>>, vector<1x1x96xf32>
    %253 = vector.shape_cast %252 : vector<1x1x96xf32> to vector<1x96xf32>
    %254 = vector.broadcast %253 : vector<1x96xf32> to vector<16x96xf32>
    %255 = arith.addf %251, %254 : vector<16x96xf32>
    %c1_119 = arith.constant 1 : index
    %c0_120 = arith.constant 0 : index
    %c0_121 = arith.constant 0 : index
    %256 = vector.load %arg12[%c1_119, %c0_120, %c0_121] : memref<2x32x32xf32, #tpu.memory_space<vmem>>, vector<1x32x32xf32>
    %257 = vector.shape_cast %256 : vector<1x32x32xf32> to vector<32x32xf32>
    %cst_122 = arith.constant 0.000000e+00 : f32
    %258 = vector.broadcast %cst_122 : f32 to vector<16x32xf32>
    %259 = vector.extract_strided_slice %255 {offsets = [0, 0], sizes = [16, 8], strides = [1, 1]} : vector<16x96xf32> to vector<16x8xf32>
    %260 = vector.extract_strided_slice %255 {offsets = [0, 32], sizes = [16, 8], strides = [1, 1]} : vector<16x96xf32> to vector<16x8xf32>
    %261 = vector.extract_strided_slice %255 {offsets = [0, 64], sizes = [16, 8], strides = [1, 1]} : vector<16x96xf32> to vector<16x8xf32>
    %cst_123 = arith.constant dense<0.000000e+00> : vector<16x16xf32>
    %262 = tpu.matmul %259, %260, %cst_123 {dimension_numbers = #tpu.dot_dimension_numbers<[1], [1], [0], [0], [0, 0, 1, 0], [], []>} : vector<16x8xf32>, vector<16x8xf32>, vector<16x16xf32> -> vector<16x16xf32>
    %cst_124 = arith.constant 0.353553385 : f32
    %263 = vector.broadcast %cst_124 : f32 to vector<16x16xf32>
    %264 = arith.mulf %262, %263 : vector<16x16xf32>
    %265 = arith.addf %264, %30 : vector<16x16xf32>
    %cst_125 = arith.constant dense<0xFF800000> : vector<16xf32>
    %266 = vector.multi_reduction <maximumf>, %265, %cst_125 [1] : vector<16x16xf32> to vector<16xf32>
    %267 = vector.shape_cast %266 : vector<16xf32> to vector<16x1xf32>
    %268 = vector.broadcast %267 : vector<16x1xf32> to vector<16x16xf32>
    %269 = arith.subf %265, %268 : vector<16x16xf32>
    %270 = math.exp %269 : vector<16x16xf32>
    %cst_126 = arith.constant dense<0.000000e+00> : vector<16xf32>
    %271 = vector.multi_reduction <add>, %270, %cst_126 [1] : vector<16x16xf32> to vector<16xf32>
    %272 = vector.shape_cast %271 : vector<16xf32> to vector<16x1xf32>
    %273 = tpu.reciprocal %272 {approx = true} : vector<16x1xf32> -> vector<16x1xf32>
    %274 = vector.broadcast %273 : vector<16x1xf32> to vector<16x16xf32>
    %275 = arith.mulf %270, %274 : vector<16x16xf32>
    %cst_127 = arith.constant dense<0.000000e+00> : vector<16x8xf32>
    %276 = tpu.matmul %275, %261, %cst_127 {dimension_numbers = #tpu.dot_dimension_numbers<[1], [0], [0], [1], [0, 0, 1, 1], [], []>} : vector<16x16xf32>, vector<16x8xf32>, vector<16x8xf32> -> vector<16x8xf32>
    %277 = vector.extract_strided_slice %257 {offsets = [0, 0], sizes = [8, 32], strides = [1, 1]} : vector<32x32xf32> to vector<8x32xf32>
    %cst_128 = arith.constant dense<0.000000e+00> : vector<16x32xf32>
    %278 = tpu.matmul %276, %277, %cst_128 {dimension_numbers = #tpu.dot_dimension_numbers<[1], [0], [0], [1], [0, 0, 1, 1], [], []>} : vector<16x8xf32>, vector<8x32xf32>, vector<16x32xf32> -> vector<16x32xf32>
    %279 = arith.addf %258, %278 : vector<16x32xf32>
    %280 = vector.extract_strided_slice %255 {offsets = [0, 8], sizes = [16, 8], strides = [1, 1]} : vector<16x96xf32> to vector<16x8xf32>
    %281 = vector.extract_strided_slice %255 {offsets = [0, 40], sizes = [16, 8], strides = [1, 1]} : vector<16x96xf32> to vector<16x8xf32>
    %282 = vector.extract_strided_slice %255 {offsets = [0, 72], sizes = [16, 8], strides = [1, 1]} : vector<16x96xf32> to vector<16x8xf32>
    %cst_129 = arith.constant dense<0.000000e+00> : vector<16x16xf32>
    %283 = tpu.matmul %280, %281, %cst_129 {dimension_numbers = #tpu.dot_dimension_numbers<[1], [1], [0], [0], [0, 0, 1, 0], [], []>} : vector<16x8xf32>, vector<16x8xf32>, vector<16x16xf32> -> vector<16x16xf32>
    %cst_130 = arith.constant 0.353553385 : f32
    %284 = vector.broadcast %cst_130 : f32 to vector<16x16xf32>
    %285 = arith.mulf %283, %284 : vector<16x16xf32>
    %286 = arith.addf %285, %30 : vector<16x16xf32>
    %cst_131 = arith.constant dense<0xFF800000> : vector<16xf32>
    %287 = vector.multi_reduction <maximumf>, %286, %cst_131 [1] : vector<16x16xf32> to vector<16xf32>
    %288 = vector.shape_cast %287 : vector<16xf32> to vector<16x1xf32>
    %289 = vector.broadcast %288 : vector<16x1xf32> to vector<16x16xf32>
    %290 = arith.subf %286, %289 : vector<16x16xf32>
    %291 = math.exp %290 : vector<16x16xf32>
    %cst_132 = arith.constant dense<0.000000e+00> : vector<16xf32>
    %292 = vector.multi_reduction <add>, %291, %cst_132 [1] : vector<16x16xf32> to vector<16xf32>
    %293 = vector.shape_cast %292 : vector<16xf32> to vector<16x1xf32>
    %294 = tpu.reciprocal %293 {approx = true} : vector<16x1xf32> -> vector<16x1xf32>
    %295 = vector.broadcast %294 : vector<16x1xf32> to vector<16x16xf32>
    %296 = arith.mulf %291, %295 : vector<16x16xf32>
    %cst_133 = arith.constant dense<0.000000e+00> : vector<16x8xf32>
    %297 = tpu.matmul %296, %282, %cst_133 {dimension_numbers = #tpu.dot_dimension_numbers<[1], [0], [0], [1], [0, 0, 1, 1], [], []>} : vector<16x16xf32>, vector<16x8xf32>, vector<16x8xf32> -> vector<16x8xf32>
    %298 = vector.extract_strided_slice %257 {offsets = [8, 0], sizes = [8, 32], strides = [1, 1]} : vector<32x32xf32> to vector<8x32xf32>
    %cst_134 = arith.constant dense<0.000000e+00> : vector<16x32xf32>
    %299 = tpu.matmul %297, %298, %cst_134 {dimension_numbers = #tpu.dot_dimension_numbers<[1], [0], [0], [1], [0, 0, 1, 1], [], []>} : vector<16x8xf32>, vector<8x32xf32>, vector<16x32xf32> -> vector<16x32xf32>
    %300 = arith.addf %279, %299 : vector<16x32xf32>
    %301 = vector.extract_strided_slice %255 {offsets = [0, 16], sizes = [16, 8], strides = [1, 1]} : vector<16x96xf32> to vector<16x8xf32>
    %302 = vector.extract_strided_slice %255 {offsets = [0, 48], sizes = [16, 8], strides = [1, 1]} : vector<16x96xf32> to vector<16x8xf32>
    %303 = vector.extract_strided_slice %255 {offsets = [0, 80], sizes = [16, 8], strides = [1, 1]} : vector<16x96xf32> to vector<16x8xf32>
    %cst_135 = arith.constant dense<0.000000e+00> : vector<16x16xf32>
    %304 = tpu.matmul %301, %302, %cst_135 {dimension_numbers = #tpu.dot_dimension_numbers<[1], [1], [0], [0], [0, 0, 1, 0], [], []>} : vector<16x8xf32>, vector<16x8xf32>, vector<16x16xf32> -> vector<16x16xf32>
    %cst_136 = arith.constant 0.353553385 : f32
    %305 = vector.broadcast %cst_136 : f32 to vector<16x16xf32>
    %306 = arith.mulf %304, %305 : vector<16x16xf32>
    %307 = arith.addf %306, %30 : vector<16x16xf32>
    %cst_137 = arith.constant dense<0xFF800000> : vector<16xf32>
    %308 = vector.multi_reduction <maximumf>, %307, %cst_137 [1] : vector<16x16xf32> to vector<16xf32>
    %309 = vector.shape_cast %308 : vector<16xf32> to vector<16x1xf32>
    %310 = vector.broadcast %309 : vector<16x1xf32> to vector<16x16xf32>
    %311 = arith.subf %307, %310 : vector<16x16xf32>
    %312 = math.exp %311 : vector<16x16xf32>
    %cst_138 = arith.constant dense<0.000000e+00> : vector<16xf32>
    %313 = vector.multi_reduction <add>, %312, %cst_138 [1] : vector<16x16xf32> to vector<16xf32>
    %314 = vector.shape_cast %313 : vector<16xf32> to vector<16x1xf32>
    %315 = tpu.reciprocal %314 {approx = true} : vector<16x1xf32> -> vector<16x1xf32>
    %316 = vector.broadcast %315 : vector<16x1xf32> to vector<16x16xf32>
    %317 = arith.mulf %312, %316 : vector<16x16xf32>
    %cst_139 = arith.constant dense<0.000000e+00> : vector<16x8xf32>
    %318 = tpu.matmul %317, %303, %cst_139 {dimension_numbers = #tpu.dot_dimension_numbers<[1], [0], [0], [1], [0, 0, 1, 1], [], []>} : vector<16x16xf32>, vector<16x8xf32>, vector<16x8xf32> -> vector<16x8xf32>
    %319 = vector.extract_strided_slice %257 {offsets = [16, 0], sizes = [8, 32], strides = [1, 1]} : vector<32x32xf32> to vector<8x32xf32>
    %cst_140 = arith.constant dense<0.000000e+00> : vector<16x32xf32>
    %320 = tpu.matmul %318, %319, %cst_140 {dimension_numbers = #tpu.dot_dimension_numbers<[1], [0], [0], [1], [0, 0, 1, 1], [], []>} : vector<16x8xf32>, vector<8x32xf32>, vector<16x32xf32> -> vector<16x32xf32>
    %321 = arith.addf %300, %320 : vector<16x32xf32>
    %322 = vector.extract_strided_slice %255 {offsets = [0, 24], sizes = [16, 8], strides = [1, 1]} : vector<16x96xf32> to vector<16x8xf32>
    %323 = vector.extract_strided_slice %255 {offsets = [0, 56], sizes = [16, 8], strides = [1, 1]} : vector<16x96xf32> to vector<16x8xf32>
    %324 = vector.extract_strided_slice %255 {offsets = [0, 88], sizes = [16, 8], strides = [1, 1]} : vector<16x96xf32> to vector<16x8xf32>
    %cst_141 = arith.constant dense<0.000000e+00> : vector<16x16xf32>
    %325 = tpu.matmul %322, %323, %cst_141 {dimension_numbers = #tpu.dot_dimension_numbers<[1], [1], [0], [0], [0, 0, 1, 0], [], []>} : vector<16x8xf32>, vector<16x8xf32>, vector<16x16xf32> -> vector<16x16xf32>
    %cst_142 = arith.constant 0.353553385 : f32
    %326 = vector.broadcast %cst_142 : f32 to vector<16x16xf32>
    %327 = arith.mulf %325, %326 : vector<16x16xf32>
    %328 = arith.addf %327, %30 : vector<16x16xf32>
    %cst_143 = arith.constant dense<0xFF800000> : vector<16xf32>
    %329 = vector.multi_reduction <maximumf>, %328, %cst_143 [1] : vector<16x16xf32> to vector<16xf32>
    %330 = vector.shape_cast %329 : vector<16xf32> to vector<16x1xf32>
    %331 = vector.broadcast %330 : vector<16x1xf32> to vector<16x16xf32>
    %332 = arith.subf %328, %331 : vector<16x16xf32>
    %333 = math.exp %332 : vector<16x16xf32>
    %cst_144 = arith.constant dense<0.000000e+00> : vector<16xf32>
    %334 = vector.multi_reduction <add>, %333, %cst_144 [1] : vector<16x16xf32> to vector<16xf32>
    %335 = vector.shape_cast %334 : vector<16xf32> to vector<16x1xf32>
    %336 = tpu.reciprocal %335 {approx = true} : vector<16x1xf32> -> vector<16x1xf32>
    %337 = vector.broadcast %336 : vector<16x1xf32> to vector<16x16xf32>
    %338 = arith.mulf %333, %337 : vector<16x16xf32>
    %cst_145 = arith.constant dense<0.000000e+00> : vector<16x8xf32>
    %339 = tpu.matmul %338, %324, %cst_145 {dimension_numbers = #tpu.dot_dimension_numbers<[1], [0], [0], [1], [0, 0, 1, 1], [], []>} : vector<16x16xf32>, vector<16x8xf32>, vector<16x8xf32> -> vector<16x8xf32>
    %340 = vector.extract_strided_slice %257 {offsets = [24, 0], sizes = [8, 32], strides = [1, 1]} : vector<32x32xf32> to vector<8x32xf32>
    %cst_146 = arith.constant dense<0.000000e+00> : vector<16x32xf32>
    %341 = tpu.matmul %339, %340, %cst_146 {dimension_numbers = #tpu.dot_dimension_numbers<[1], [0], [0], [1], [0, 0, 1, 1], [], []>} : vector<16x8xf32>, vector<8x32xf32>, vector<16x32xf32> -> vector<16x32xf32>
    %342 = arith.addf %321, %341 : vector<16x32xf32>
    %343 = arith.addf %222, %342 : vector<16x32xf32>
    %c1_147 = arith.constant 1 : index
    %c0_148 = arith.constant 0 : index
    %c0_149 = arith.constant 0 : index
    %344 = vector.load %arg13[%c1_147, %c0_148, %c0_149] : memref<2x1x32xf32, #tpu.memory_space<vmem>>, vector<1x1x32xf32>
    %345 = vector.shape_cast %344 : vector<1x1x32xf32> to vector<1x32xf32>
    %346 = vector.broadcast %345 : vector<1x32xf32> to vector<16x32xf32>
    %347 = arith.addf %343, %346 : vector<16x32xf32>
    %c1_150 = arith.constant 1 : index
    %c0_151 = arith.constant 0 : index
    %c0_152 = arith.constant 0 : index
    %348 = vector.load %arg14[%c1_150, %c0_151, %c0_152] : memref<2x1x32xf32, #tpu.memory_space<vmem>>, vector<1x1x32xf32>
    %349 = vector.shape_cast %348 : vector<1x1x32xf32> to vector<1x32xf32>
    %c1_153 = arith.constant 1 : index
    %c0_154 = arith.constant 0 : index
    %c0_155 = arith.constant 0 : index
    %350 = vector.load %arg15[%c1_153, %c0_154, %c0_155] : memref<2x1x32xf32, #tpu.memory_space<vmem>>, vector<1x1x32xf32>
    %351 = vector.shape_cast %350 : vector<1x1x32xf32> to vector<1x32xf32>
    %cst_156 = arith.constant dense<0.000000e+00> : vector<16xf32>
    %352 = vector.multi_reduction <add>, %347, %cst_156 [1] : vector<16x32xf32> to vector<16xf32>
    %353 = vector.shape_cast %352 : vector<16xf32> to vector<16x1xf32>
    %cst_157 = arith.constant 3.200000e+01 : f32
    %354 = vector.broadcast %cst_157 : f32 to vector<16x1xf32>
    %355 = arith.divf %353, %354 : vector<16x1xf32>
    %356 = vector.broadcast %355 : vector<16x1xf32> to vector<16x32xf32>
    %357 = arith.subf %347, %356 : vector<16x32xf32>
    %358 = arith.mulf %357, %357 : vector<16x32xf32>
    %cst_158 = arith.constant dense<0.000000e+00> : vector<16xf32>
    %359 = vector.multi_reduction <add>, %358, %cst_158 [1] : vector<16x32xf32> to vector<16xf32>
    %360 = vector.shape_cast %359 : vector<16xf32> to vector<16x1xf32>
    %cst_159 = arith.constant 3.200000e+01 : f32
    %361 = vector.broadcast %cst_159 : f32 to vector<16x1xf32>
    %362 = arith.divf %360, %361 : vector<16x1xf32>
    %363 = vector.broadcast %355 : vector<16x1xf32> to vector<16x32xf32>
    %364 = arith.subf %347, %363 : vector<16x32xf32>
    %cst_160 = arith.constant 9.99999974E-6 : f32
    %365 = vector.broadcast %cst_160 : f32 to vector<16x1xf32>
    %366 = arith.addf %362, %365 : vector<16x1xf32>
    %367 = math.rsqrt %366 : vector<16x1xf32>
    %368 = vector.broadcast %367 : vector<16x1xf32> to vector<16x32xf32>
    %369 = arith.mulf %364, %368 : vector<16x32xf32>
    %370 = vector.broadcast %349 : vector<1x32xf32> to vector<16x32xf32>
    %371 = arith.mulf %369, %370 : vector<16x32xf32>
    %372 = vector.broadcast %351 : vector<1x32xf32> to vector<16x32xf32>
    %373 = arith.addf %371, %372 : vector<16x32xf32>
    %c1_161 = arith.constant 1 : index
    %c0_162 = arith.constant 0 : index
    %c0_163 = arith.constant 0 : index
    %374 = vector.load %arg16[%c1_161, %c0_162, %c0_163] : memref<2x32x128xf32, #tpu.memory_space<vmem>>, vector<1x32x128xf32>
    %375 = vector.shape_cast %374 : vector<1x32x128xf32> to vector<32x128xf32>
    %cst_164 = arith.constant dense<0.000000e+00> : vector<16x128xf32>
    %376 = tpu.matmul %373, %375, %cst_164 {dimension_numbers = #tpu.dot_dimension_numbers<[1], [0], [0], [1], [0, 0, 1, 1], [], []>} : vector<16x32xf32>, vector<32x128xf32>, vector<16x128xf32> -> vector<16x128xf32>
    %c1_165 = arith.constant 1 : index
    %c0_166 = arith.constant 0 : index
    %c0_167 = arith.constant 0 : index
    %377 = vector.load %arg17[%c1_165, %c0_166, %c0_167] : memref<2x1x128xf32, #tpu.memory_space<vmem>>, vector<1x1x128xf32>
    %378 = vector.shape_cast %377 : vector<1x1x128xf32> to vector<1x128xf32>
    %379 = vector.broadcast %378 : vector<1x128xf32> to vector<16x128xf32>
    %380 = arith.addf %376, %379 : vector<16x128xf32>
    %cst_168 = arith.constant 1.702000e+00 : f32
    %381 = vector.broadcast %cst_168 : f32 to vector<16x128xf32>
    %382 = arith.mulf %381, %380 : vector<16x128xf32>
    %383 = arith.negf %382 : vector<16x128xf32>
    %384 = math.exp %383 : vector<16x128xf32>
    %cst_169 = arith.constant 1.000000e+00 : f32
    %385 = vector.broadcast %cst_169 : f32 to vector<16x128xf32>
    %386 = arith.addf %385, %384 : vector<16x128xf32>
    %387 = arith.divf %385, %386 : vector<16x128xf32>
    %388 = arith.mulf %380, %387 : vector<16x128xf32>
    %c1_170 = arith.constant 1 : index
    %c0_171 = arith.constant 0 : index
    %c0_172 = arith.constant 0 : index
    %389 = vector.load %arg18[%c1_170, %c0_171, %c0_172] : memref<2x128x32xf32, #tpu.memory_space<vmem>>, vector<1x128x32xf32>
    %390 = vector.shape_cast %389 : vector<1x128x32xf32> to vector<128x32xf32>
    %cst_173 = arith.constant dense<0.000000e+00> : vector<16x32xf32>
    %391 = tpu.matmul %388, %390, %cst_173 {dimension_numbers = #tpu.dot_dimension_numbers<[1], [0], [0], [1], [0, 0, 1, 1], [], []>} : vector<16x128xf32>, vector<128x32xf32>, vector<16x32xf32> -> vector<16x32xf32>
    %392 = arith.addf %347, %391 : vector<16x32xf32>
    %c1_174 = arith.constant 1 : index
    %c0_175 = arith.constant 0 : index
    %c0_176 = arith.constant 0 : index
    %393 = vector.load %arg19[%c1_174, %c0_175, %c0_176] : memref<2x1x32xf32, #tpu.memory_space<vmem>>, vector<1x1x32xf32>
    %394 = vector.shape_cast %393 : vector<1x1x32xf32> to vector<1x32xf32>
    %395 = vector.broadcast %394 : vector<1x32xf32> to vector<16x32xf32>
    %396 = arith.addf %392, %395 : vector<16x32xf32>
    %c0_177 = arith.constant 0 : index
    %c0_178 = arith.constant 0 : index
    %397 = vector.load %arg22[%c0_177, %c0_178] : memref<2x16xf32, #tpu.memory_space<vmem>>, vector<2x16xf32>
    %cst_179 = arith.constant dense<0.000000e+00> : vector<2x32xf32>
    %398 = tpu.matmul %397, %396, %cst_179 {dimension_numbers = #tpu.dot_dimension_numbers<[1], [0], [0], [1], [0, 0, 1, 1], [], []>} : vector<2x16xf32>, vector<16x32xf32>, vector<2x32xf32> -> vector<2x32xf32>
    %c0_180 = arith.constant 0 : index
    %c0_181 = arith.constant 0 : index
    %399 = vector.load %arg20[%c0_180, %c0_181] : memref<1x32xf32, #tpu.memory_space<vmem>>, vector<1x32xf32>
    %c0_182 = arith.constant 0 : index
    %c0_183 = arith.constant 0 : index
    %400 = vector.load %arg21[%c0_182, %c0_183] : memref<1x32xf32, #tpu.memory_space<vmem>>, vector<1x32xf32>
    %cst_184 = arith.constant dense<0.000000e+00> : vector<2xf32>
    %401 = vector.multi_reduction <add>, %398, %cst_184 [1] : vector<2x32xf32> to vector<2xf32>
    %402 = vector.shape_cast %401 : vector<2xf32> to vector<2x1xf32>
    %cst_185 = arith.constant 3.200000e+01 : f32
    %403 = vector.broadcast %cst_185 : f32 to vector<2x1xf32>
    %404 = arith.divf %402, %403 : vector<2x1xf32>
    %405 = vector.broadcast %404 : vector<2x1xf32> to vector<2x32xf32>
    %406 = arith.subf %398, %405 : vector<2x32xf32>
    %407 = arith.mulf %406, %406 : vector<2x32xf32>
    %cst_186 = arith.constant dense<0.000000e+00> : vector<2xf32>
    %408 = vector.multi_reduction <add>, %407, %cst_186 [1] : vector<2x32xf32> to vector<2xf32>
    %409 = vector.shape_cast %408 : vector<2xf32> to vector<2x1xf32>
    %cst_187 = arith.constant 3.200000e+01 : f32
    %410 = vector.broadcast %cst_187 : f32 to vector<2x1xf32>
    %411 = arith.divf %409, %410 : vector<2x1xf32>
    %412 = vector.broadcast %404 : vector<2x1xf32> to vector<2x32xf32>
    %413 = arith.subf %398, %412 : vector<2x32xf32>
    %cst_188 = arith.constant 9.99999974E-6 : f32
    %414 = vector.broadcast %cst_188 : f32 to vector<2x1xf32>
    %415 = arith.addf %411, %414 : vector<2x1xf32>
    %416 = math.rsqrt %415 : vector<2x1xf32>
    %417 = vector.broadcast %416 : vector<2x1xf32> to vector<2x32xf32>
    %418 = arith.mulf %413, %417 : vector<2x32xf32>
    %419 = vector.broadcast %399 : vector<1x32xf32> to vector<2x32xf32>
    %420 = arith.mulf %418, %419 : vector<2x32xf32>
    %421 = vector.broadcast %400 : vector<1x32xf32> to vector<2x32xf32>
    %422 = arith.addf %420, %421 : vector<2x32xf32>
    %c0_189 = arith.constant 0 : index
    %c0_190 = arith.constant 0 : index
    %423 = vector.load %arg23[%c0_189, %c0_190] : memref<32x16xf32, #tpu.memory_space<vmem>>, vector<32x16xf32>
    %cst_191 = arith.constant dense<0.000000e+00> : vector<2x16xf32>
    %424 = tpu.matmul %422, %423, %cst_191 {dimension_numbers = #tpu.dot_dimension_numbers<[1], [0], [0], [1], [0, 0, 1, 1], [], []>} : vector<2x32xf32>, vector<32x16xf32>, vector<2x16xf32> -> vector<2x16xf32>
    %c0_192 = arith.constant 0 : index
    %c0_193 = arith.constant 0 : index
    %425 = vector.load %arg24[%c0_192, %c0_193] : memref<2x16xf32, #tpu.memory_space<vmem>>, vector<2x16xf32>
    tpu.vector_store %arg24[%c0_192, %c0_193], %424 {strides = array<i32>} : memref<2x16xf32, #tpu.memory_space<vmem>>, vector<2x16xf32>,
    return
  }
}

</mosaic_0001>

<bundles_post_ra>
// kernel: image_encoder_vptd.1
= control target key start
LH: loop header
LB: loop body
LE: loop exit
PB: predicated region body
PF: predicated region fallthrough
CT: control target
= control target key end

     0   :  { %s5185_s0 = inlined_call_operand.vmem [shape: f32[16,192], index: 0, kind: input, shape index: {}]   ;;  %s5186_s1 = inlined_call_operand.vmem [shape: f32[192,32], index: 1, kind: input, shape index: {}]   ;;  %s5187_s2 = inlined_call_operand.vmem [shape: f32[16,32], index: 2, kind: input, shape index: {}]   ;;  %s5188_s3 = inlined_call_operand.vmem [shape: f32[1,32], index: 3, kind: input, shape index: {}]   ;;  %s5189_s4 = inlined_call_operand.vmem [shape: f32[1,32], index: 4, kind: input, shape index: {}]   ;;  %s5190_s5 = inlined_call_operand.vmem [shape: f32[2,16,32], index: 5, kind: input, shape index: {}]   ;;  %s5191_s6 = inlined_call_operand.vmem [shape: f32[16,1], index: 6, kind: input, shape index: {}]   ;;  %s5192_s7 = inlined_call_operand.vmem [shape: f32[16,16], index: 7, kind: input, shape index: {}]   ;;  %s5193_s8 = inlined_call_operand.vmem [shape: f32[2,1,32], index: 8, kind: input, shape index: {}]   ;;  %s5194_s9 = inlined_call_operand.vmem [shape: f32[2,1,32], index: 9, kind: input, shape index: {}]   ;;  %s5195_s10 = inlined_call_operand.vmem [shape: f32[2,32,96], index: 10, kind: input, shape index: {}]   ;;  %s5196_s11 = inlined_call_operand.vmem [shape: f32[2,1,96], index: 11, kind: input, shape index: {}]   ;;  %s5197_s12 = inlined_call_operand.vmem [shape: f32[2,32,32], index: 12, kind: input, shape index: {}]   ;;  %s5198_s13 = inlined_call_operand.vmem [shape: f32[2,1,32], index: 13, kind: input, shape index: {}]   ;;  %s5199_s14 = inlined_call_operand.vmem [shape: f32[2,1,32], index: 14, kind: input, shape index: {}]   ;;  %s5200_s15 = inlined_call_operand.vmem [shape: f32[2,1,32], index: 15, kind: input, shape index: {}]   ;;  %s5201_s16 = inlined_call_operand.vmem [shape: f32[2,32,128], index: 16, kind: input, shape index: {}]   ;;  %s5202_s17 = inlined_call_operand.vmem [shape: f32[2,1,128], index: 17, kind: input, shape index: {}]   ;;  %s5203_s18 = inlined_call_operand.vmem [shape: f32[2,128,32], index: 18, kind: input, shape index: {}]   ;;  %s5204_s19 = inlined_call_operand.vmem [shape: f32[2,1,32], index: 19, kind: input, shape index: {}]   ;;  %s5205_s20 = inlined_call_operand.vmem [shape: f32[1,32], index: 20, kind: input, shape index: {}]   ;;  %s5206_s21 = inlined_call_operand.vmem [shape: f32[1,32], index: 21, kind: input, shape index: {}]   ;;  %s5207_s22 = inlined_call_operand.vmem [shape: f32[2,16], index: 22, kind: input, shape index: {}]   ;;  %s5208_s23 = inlined_call_operand.vmem [shape: f32[32,16], index: 23, kind: input, shape index: {}]   ;;  %s5209_s24 = inlined_call_operand.hbm [shape: f32[2,16], index: 24, kind: output, shape index: {}]  }
   0x1   :  { %5231 = sst [smem:[#allocation5_spill]] %s5185_s0 }
   0x2   :  { %5232 = sst [smem:[#allocation6_spill]] %s5186_s1 }
   0x3   :  { %5233 = sst [smem:[#allocation7_spill]] %s5187_s2 }
   0x4   :  { %5234 = sst [smem:[#allocation8_spill]] %s5188_s3 }
   0x5   :  { %5235 = sst [smem:[#allocation9_spill]] %s5189_s4 }
   0x6   :  { %5236 = sst [smem:[#allocation10_spill]] %s5190_s5 }
   0x7   :  { %5237 = sst [smem:[#allocation11_spill]] %s5191_s6 }
   0x8   :  { %5238 = sst [smem:[#allocation12_spill]] %s5192_s7 }
   0x9   :  { %5239 = sst [smem:[#allocation13_spill]] %s5193_s8 }
   0xa   :  { %s5240_s27 = sld [smem:[#allocation6_spill]]  ;;  %v4305_v1 = vmov 0.0   ;;  %vm108_vm0 = vcmask 523264  }
   0xb   :  { %115 = vmatprep.subr.mxu0 %v4305_v1  ;;  %s5241_s4 = sld [smem:[#allocation5_spill]] }
  0x10   :  { %v97_v0 = vld [vmem:[%s5240_s27 + $0x78] sm:$0xff]  ;;  %v96_v2 = vld [vmem:[%s5240_s27 + $0x70] sm:$0xff]  ;;  %v95_v3 = vld [vmem:[%s5240_s27 + $0x68] sm:$0xff] }
  0x11   :  { %116 = vmatpush1.msra.mxu0 %v97_v0  ;;  %v94_v4 = vld [vmem:[%s5240_s27 + $0x60] sm:$0xff]  ;;  %v93_v5 = vld [vmem:[%s5240_s27 + $0x58] sm:$0xff]  ;;  %v79_v6 = vld [vmem:[%s5241_s4 + $0x8] sm:$0xff] }
  0x12   :  { %117 = vmatprep.subr.mxu0 %v4305_v1  ;;  %v92_v7 = vld [vmem:[%s5240_s27 + $0x50] sm:$0xff]  ;;  %3584 = vmatprep.mubr.msk.f32.mxu0 %vm108_vm0, %v79_v6 }
  0x13   :  { %118 = vmatpush1.msra.mxu0 %v96_v2 }
  0x14   :  { %119 = vmatprep.subr.mxu0 %v4305_v1 }
  0x15   :  { %120 = vmatpush1.msra.mxu0 %v95_v3 }
  0x16   :  { %121 = vmatprep.subr.mxu0 %v4305_v1 }
  0x17   :  { %122 = vmatpush1.msra.mxu0 %v94_v4 }
  0x18   :  { %123 = vmatprep.subr.mxu0 %v4305_v1 }
  0x19   :  { %29 = vsyncpa [#allocation3], 0  ;;  %124 = vmatpush1.msra.mxu0 %v93_v5  ;;  %v91_v8 = vld [vmem:[%s5240_s27 + $0x48] sm:$0xff]  ;;  %v90_v9 = vld [vmem:[%s5240_s27 + $0x40] sm:$0xff]  ;;  %s5242_s29 = sld [smem:[#allocation11_spill]]  ;;  %v4306_v31 = vmov 0  }
  0x1a   :  { %125 = vmatprep.subr.mxu0 %v4305_v1  ;;  %v89_v10 = vld [vmem:[%s5240_s27 + $0x38] sm:$0xff]  ;;  %v88_v11 = vld [vmem:[%s5240_s27 + $0x30] sm:$0xff]  ;;  %v87_v12 = vld [vmem:[%s5240_s27 + $0x28] sm:$0xff]  ;;  %4178 = vset.pattern.permute.xlu1 %v4306_v31  ;;  %s5243_s25 = sld [smem:[#allocation7_spill]]  ;;  %vm192_vm1 = vcmask 261120   ;;  %vm416_vm2 = vcmask 64512  }
  0x1b   :  { %126 = vmatpush1.msra.mxu0 %v92_v7  ;;  %v86_v13 = vld [vmem:[%s5240_s27 + $0x20] sm:$0xff]  ;;  %v85_v14 = vld [vmem:[%s5240_s27 + $0x18] sm:$0xff]  ;;  %v84_v15 = vld [vmem:[%s5240_s27 + $0x10] sm:$0xff]  ;;  %4177 = vset.pattern.permute.xlu0 %v4306_v31  ;;  %s5244_s26 = sld [smem:[#allocation8_spill]]  ;;  %vm504_vm3 = vcmask 130048   ;;  %s4308_s28 = smov 64  }
  0x1c   :  { %127 = vmatprep.subr.mxu0 %v4305_v1  ;;  %v83_v16 = vld [vmem:[%s5240_s27 + $0x8] sm:$0xff]  ;;  %v82_v17 = vld [vmem:[%s5240_s27] sm:$0xff]  ;;  %v105_v18 = vld [vmem:[%s5240_s27 + $0xb8] sm:$0xff]  ;;  %s5246_s0 = sld [smem:[#allocation10_spill]]  ;;  %s4309_s6 = smov 88   ;;  %vm4318_vm4 = vmmov 0  }
  0x1d   :  { %128 = vmatpush1.msra.mxu0 %v91_v8  ;;  %v104_v19 = vld [vmem:[%s5240_s27 + $0xb0] sm:$0xff]  ;;  %v103_v20 = vld [vmem:[%s5240_s27 + $0xa8] sm:$0xff]  ;;  %v102_v21 = vld [vmem:[%s5240_s27 + $0xa0] sm:$0xff]  ;;  %s5247_s2 = sld [smem:[#allocation13_spill]]  ;;  %s5227_s7 = smov 80   ;;  %vm3463_vm5 = vcmask 254976  }
  0x1e   :  { %129 = vmatprep.subr.mxu0 %v4305_v1  ;;  %v101_v22 = vld [vmem:[%s5240_s27 + $0x98] sm:$0xff]  ;;  %v100_v23 = vld [vmem:[%s5240_s27 + $0x90] sm:$0xff]  ;;  %v99_v24 = vld [vmem:[%s5240_s27 + $0x88] sm:$0xff]  ;;  %s5248_s1 = sld [smem:[#allocation12_spill]]  ;;  %s5225_s30 = smov 112   ;;  %vm3568_vm6 = vcmask 123904  }
  0x1f   :  { %130 = vmatpush1.msra.mxu0 %v90_v9  ;;  %v98_v25 = vld [vmem:[%s5240_s27 + $0x80] sm:$0xff]  ;;  %v81_v27 = vld [vmem:[%s5241_s4 + $0x18] sm:$0xff]  ;;  %v80_v28 = vld [vmem:[%s5241_s4 + $0x10] sm:$0xff]  ;;  %s5245_s27 = sld [smem:[#allocation9_spill]]  ;;  %s5223_s3 = smov 72  }
  0x20   :  { %131 = vmatprep.subr.mxu0 %v4305_v1  ;;  %v78_v26 = vld [vmem:[%s5241_s4] sm:$0xff]  ;;  %v237_v30 = vld [vmem:[%s5242_s29 + $0x8] sm:$0xff]  ;;  %v317_v31 = vld [vmem:[%s5195_s10 + $0x18] sm:$0xff]  ;;  %s5221_s4 = smov 104   ;;  %s5219_s8 = smov 40  }
  0x21   :  { %132 = vmatpush1.msra.mxu0 %v89_v10  ;;  %v236_v29 = vld [vmem:[%s5242_s29] sm:$0xff]  ;;  %v241_v32 = vsub.f32 1.0, %v237_v30  ;;  %v107_v37 = vld [vmem:[%s5243_s25 + $0x8] sm:$0xff]  ;;  %3878 = vmatprep.subr.mxu1 %v317_v31  ;;  %s5229_s29 = smov 56   ;;  %s5251_s5 = smov 112  }
  0x22   :  { %133 = vmatprep.subr.mxu0 %v4305_v1  ;;  %258 = vperm.xlu1 %4178, %v236_v29   ;;  %v106_v33 = vld [vmem:[%s5243_s25] sm:$0xff]  ;;  %v240_v43 = vsub.f32 1.0, %v236_v29  ;;  %s4307_s25 = smov 96  }
  0x23   :  { %134 = vmatpush1.msra.mxu0 %v88_v11  ;;  %v3586_v63 = vld [vmem:[%s5244_s26] ss:$0 sm:$0xff]  ;;  %3879 = vmatpush3.msra.mxu1 %v317_v31  ;;  %s5217_s26 = smov 48  }
  0x24   :  { %135 = vmatprep.subr.mxu0 %v4305_v1  ;;  %v254_v5 = vld [vmem:[%s5246_s0] sm:$0xff] }
  0x25   :  { %136 = vmatpush1.msra.mxu0 %v87_v12  ;;  %v3587_v2 = vld [vmem:[%s5245_s27] ss:$0 sm:$0xff]  ;;  %v255_v12 = vld [vmem:[%s5246_s0 + $0x8] sm:$0xff]  ;;  %s4310_s27 = smov 120  }
  0x26   :  { %137 = vmatprep.subr.mxu0 %v4305_v1  ;;  %249 = vperm.xlu1 %4178, %v241_v32   ;;  %v316_v32 = vld [vmem:[%s5195_s10 + $0x10] sm:$0xff] }
  0x27   :  { %138 = vmatpush1.msra.mxu0 %v86_v13  ;;  %3880 = vmatprep.subr.mxu1 %v316_v32 }
  0x28   :  { %139 = vmatprep.subr.mxu0 %v4305_v1  ;;  %3881 = vmatpush3.msra.mxu1 %v316_v32 }
  0x29   :  { %140 = vmatpush1.msra.mxu0 %v85_v14 }
  0x2a   :  { %141 = vmatprep.subr.mxu0 %v4305_v1 }
  0x2b   :  { %142 = vmatpush1.msra.mxu0 %v84_v15 }
  0x2c   :  { %143 = vmatprep.subr.mxu0 %v4305_v1 }
  0x2d   :  { %144 = vmatpush1.msra.mxu0 %v83_v16 }
  0x2e   :  { %145 = vmatprep.subr.mxu0 %v4305_v1 }
  0x2f   :  { %146 = vmatpush1.msra.mxu0 %v82_v17 }
  0x30   :  { %163 = vmatprep.subr.mxu0 %v4305_v1 }
  0x31   :  { %164 = vmatpush2.msra.mxu0 %v105_v18 }
  0x32   :  { %165 = vmatprep.subr.mxu0 %v4305_v1 }
  0x33   :  { %166 = vmatpush2.msra.mxu0 %v104_v19 }
  0x34   :  { %167 = vmatprep.subr.mxu0 %v4305_v1 }
  0x35   :  { %168 = vmatpush2.msra.mxu0 %v103_v20 }
  0x36   :  { %169 = vmatprep.subr.mxu0 %v4305_v1 }
  0x37   :  { %170 = vmatpush2.msra.mxu0 %v102_v21 }
  0x38   :  { %171 = vmatprep.subr.mxu0 %v4305_v1 }
  0x39   :  { %172 = vmatpush2.msra.mxu0 %v101_v22 }
  0x3a   :  { %173 = vmatprep.subr.mxu0 %v4305_v1 }
  0x3b   :  { %174 = vmatpush2.msra.mxu0 %v100_v23 }
  0x3c   :  { %175 = vmatprep.subr.mxu0 %v4305_v1 }
  0x3d   :  { %176 = vmatpush2.msra.mxu0 %v99_v24 }
  0x3e   :  { %177 = vmatprep.subr.mxu0 %v4305_v1 }
  0x3f   :  { %178 = vmatpush2.msra.mxu0 %v98_v25 }
  0x40   :  { %180 = vmatmul.mubr.f32.vlgmr.msra.gmra.mxu0 %v78_v26 }
  0x41   :  { %3585 = vmatprep.mubr.msk.f32.mxu0 %vm108_vm0, %v81_v27 }
  0x44   :  { %185 = vmatmul.mubr.f32.gmra.mxu0 %v80_v28 }
  0x9d   :  { %v4571_v54 = vpop.permute.xlu1 %258 }
  0x9e   :  { %v266_v9 = vmul.f32 %v4571_v54, %v254_v5 }
  0xa1   :  { %v4573_v55 = vpop.permute.xlu1 %249 }
 0x100   :  { %v181_v34 = vpop.f32.mrf.mxu0 }
 0x101   :  { %v182_v35 = vadd.f32 %v181_v34, %v106_v33  ;;  %v315_v33 = vld [vmem:[%s5195_s10 + $0x8] sm:$0xff]  ;;  %v314_v34 = vld [vmem:[%s5195_s10] sm:$0xff] }
 0x102   :  { %v183_v36 = vpop.f32.mrf.mxu0  ;;  %3882 = vmatprep.subr.mxu1 %v315_v33 }
 0x103   :  { %v193_v38 = vsel %vm192_vm1, %v182_v35, 0.0  ;;  %3883 = vmatpush3.msra.mxu1 %v315_v33 }
 0x104   :  { %v186_v39 = vpop.f32.mrf.mxu0  ;;  %194 = vadd.xlane.f32.xlu0 %v193_v38  ;;  %3884 = vmatprep.subr.mxu1 %v314_v34 }
 0x105   :  { %v187_v40 = vadd.f32 %v186_v39, %v107_v37  ;;  %3885 = vmatpush3.msra.mxu1 %v314_v34 }
 0x106   :  { %v188_v41 = vpop.f32.mrf.mxu0 }
 0x107   :  { %v196_v42 = vsel %vm192_vm1, %v187_v40, 0.0 }
 0x108   :  { %197 = vadd.xlane.f32.xlu0 %v196_v42  ;;  %v3588_v42 = vld [vmem:[%s5247_s2] ss:$0 sm:$0xff] }
 0x11e   :  { %244 = vperm.xlu0 %4177, %v240_v43  }
 0x18d   :  { %v195_v44 = vpop.xlane.xlu0 %194 }
 0x18e   :  { %v200_v45 = vmul.f32 0.03125, %v195_v44  ;;  %v3589_v44 = vld [vmem:[%s5194_s9] ss:$0 sm:$0xff] }
 0x190   :  { %v202_v46 = vsub.f32 %v182_v35, %v200_v45 }
 0x191   :  { %v198_v47 = vpop.xlane.xlu0 %197 }
 0x192   :  { %v201_v48 = vmul.f32 0.03125, %v198_v47  ;;  %v204_v49 = vmul.f32 %v202_v46, %v202_v46 }
 0x194   :  { %v203_v50 = vsub.f32 %v187_v40, %v201_v48  ;;  %v206_v51 = vsel %vm192_vm1, %v204_v49, 0.0 }
 0x195   :  { %207 = vadd.xlane.f32.xlu1 %v206_v51  ;;  %v3590_v51 = vld [vmem:[%s5196_s11] ss:$0 sm:$0xff] }
 0x196   :  { %v205_v52 = vmul.f32 %v203_v50, %v203_v50 }
 0x198   :  { %v209_v53 = vsel %vm192_vm1, %v205_v52, 0.0 }
 0x199   :  { %210 = vadd.xlane.f32.xlu1 %v209_v53  ;;  %v4584_v6 = vpop.permute.xlu0 %244 }
 0x1aa   :  { %263 = vperm.xlu1 %4178, %v237_v30  }
 0x21e   :  { %v208_v56 = vpop.xlane.xlu1 %207 }
 0x21f   :  { %v212_v57 = vmul.f32 0.03125, %v208_v56 }
 0x221   :  { %v214_v58 = vadd.f32 1e-05, %v212_v57 }
 0x222   :  { %v211_v59 = vpop.xlane.xlu1 %210 }
 0x223   :  { %4179 = vrsqrt.f32 %v214_v58  ;;  %v213_v60 = vmul.f32 0.03125, %v211_v59 }
 0x225   :  { %v215_v61 = vadd.f32 1e-05, %v213_v60 }
 0x226   :  { %v4591_v13 = vpop.permute.xlu1 %263 }
 0x227   :  { %4181 = vrsqrt.f32 %v215_v61  ;;  %v267_v16 = vmul.f32 %v4591_v13, %v255_v12  ;;  %v4649_v61 = vld [vmem:[%s5248_s1 + $0x8] sm:$0xff] }
 0x230   :  { %v4180_v62 = vpop.eup %4179 }
 0x231   :  { %v218_v0 = vmul.f32 %v4180_v62, %v202_v46 }
 0x233   :  { %v226_v3 = vmul.f32 %v3586_v63, %v218_v0  ;;  %v4654_v0 = vld [vmem:[%s5248_s1] sm:$0xff] }
 0x234   :  { %v4182_v4 = vpop.eup %4181 }
 0x235   :  { %v219_v7 = vmul.f32 %v4182_v4, %v203_v50  ;;  %v234_v8 = vadd.f32 %v3587_v2, %v226_v3 }
 0x237   :  { %v227_v10 = vmul.f32 %v3586_v63, %v219_v7  ;;  %v252_v11 = vmul.f32 %v4584_v6, %v234_v8 }
 0x239   :  { %v235_v14 = vadd.f32 %v3587_v2, %v227_v10  ;;  %v4593_v15 = vadd.f32 %v266_v9, %v252_v11 }
 0x23b   :  { %v272_v17 = vsel %vm192_vm1, %v4593_v15, 0.0  ;;  %v253_v18 = vmul.f32 %v4573_v55, %v235_v14 }
 0x23c   :  { %273 = vadd.xlane.f32.xlu1 %v272_v17 }
 0x23d   :  { %v4599_v19 = vadd.f32 %v267_v16, %v253_v18 }
 0x23f   :  { %v275_v20 = vsel %vm192_vm1, %v4599_v19, 0.0 }
 0x240   :  { %276 = vadd.xlane.f32.xlu0 %v275_v20 }
 0x2c5   :  { %v274_v21 = vpop.xlane.xlu1 %273 }
 0x2c6   :  { %v278_v22 = vmul.f32 0.03125, %v274_v21 }
 0x2c8   :  { %v280_v23 = vsub.f32 %v4593_v15, %v278_v22 }
 0x2c9   :  { %v277_v24 = vpop.xlane.xlu0 %276 }
 0x2ca   :  { %v279_v25 = vmul.f32 0.03125, %v277_v24  ;;  %v282_v26 = vmul.f32 %v280_v23, %v280_v23 }
 0x2cc   :  { %v281_v27 = vsub.f32 %v4599_v19, %v279_v25  ;;  %v284_v28 = vsel %vm192_vm1, %v282_v26, 0.0 }
 0x2cd   :  { %285 = vadd.xlane.f32.xlu1 %v284_v28 }
 0x2ce   :  { %v283_v29 = vmul.f32 %v281_v27, %v281_v27 }
 0x2d0   :  { %v287_v30 = vsel %vm192_vm1, %v283_v29, 0.0 }
 0x2d1   :  { %288 = vadd.xlane.f32.xlu1 %v287_v30 }
 0x356   :  { %v286_v35 = vpop.xlane.xlu1 %285 }
 0x357   :  { %v290_v36 = vmul.f32 0.03125, %v286_v35 }
 0x359   :  { %v292_v37 = vadd.f32 1e-05, %v290_v36 }
 0x35a   :  { %v289_v38 = vpop.xlane.xlu1 %288 }
 0x35b   :  { %4183 = vrsqrt.f32 %v292_v37  ;;  %v291_v39 = vmul.f32 0.03125, %v289_v38 }
 0x35d   :  { %v293_v40 = vadd.f32 1e-05, %v291_v39 }
 0x35f   :  { %4185 = vrsqrt.f32 %v293_v40 }
 0x368   :  { %v4184_v41 = vpop.eup %4183 }
 0x369   :  { %v296_v43 = vmul.f32 %v4184_v41, %v280_v23 }
 0x36b   :  { %v304_v45 = vmul.f32 %v3588_v42, %v296_v43 }
 0x36c   :  { %v4186_v46 = vpop.eup %4185 }
 0x36d   :  { %v297_v47 = vmul.f32 %v4186_v46, %v281_v27  ;;  %v312_v48 = vadd.f32 %v3589_v44, %v304_v45 }
 0x36f   :  { %v305_v49 = vmul.f32 %v3588_v42, %v297_v47  ;;  %3886 = vmatprep.mubr.msk.f32.mxu1 %vm192_vm1, %v312_v48 }
 0x371   :  { %v313_v50 = vadd.f32 %v3589_v44, %v305_v49 }
 0x373   :  { %3887 = vmatmul.mubr.msk.f32.vlgmr.msra.gmra.mxu1 %vm192_vm1, %v313_v50 }
 0x433   :  { %v3888_v52 = vpop.f32.mrf.mxu1 }
 0x434   :  { %v4630_v53 = vadd.f32 %v3888_v52, %v3590_v51 }
 0x435   :  { %v397_v56 = vpop.f32.mrf.mxu1 }
 0x436   :  { %v4632_v57 = vadd.f32 %v3590_v51, %v397_v56  ;;  %414 = vrot.lane.b32.xlu1 %v4630_v53, %s4307_s25 }
 0x438   :  { %412 = vrot.lane.b32.xlu0 %v4632_v57, %s4307_s25  ;;  %3893 = vmatprep.mubr.msk.f32.mxu1 %vm416_vm2, %v4632_v57 }
 0x4a8   :  { %v415_v58 = vpop.permute.xlu1 %414 }
 0x4a9   :  { %3889 = vmatprep.subr.msk.mxu1 %vm416_vm2, %v415_v58 }
 0x4aa   :  { %3890 = vmatpush3.xpose.msk.msra.mxu1 %vm416_vm2, %v415_v58  ;;  %v413_v59 = vpop.permute.xlu0 %412 }
 0x4ab   :  { %3891 = vmatprep.subr.msk.mxu1 %vm416_vm2, %v413_v59 }
 0x4ae   :  { %3892 = vmatpush3.xpose.msk.msra.mxu1 %vm416_vm2, %v413_v59 }
 0x4b1   :  { %3894 = vmatmul.mubr.msk.f32.vlgmr.msra.gmra.mxu1 %vm416_vm2, %v4630_v53 }
 0x571   :  { %v3895_v60 = vpop.f32.mrf.mxu1 }
 0x572   :  { %v501_v62 = vmul.f32 0.35355338, %v3895_v60 }
 0x573   :  { %v491_v63 = vpop.f32.mrf.mxu1 }
 0x574   :  { %v500_v2 = vmul.f32 0.35355338, %v491_v63  ;;  %v503_v3 = vadd.f32 %v501_v62, %v4649_v61 }
 0x576   :  { %v508_v4 = vsel %vm504_vm3, %v503_v3, -inf  ;;  %v502_v5 = vadd.f32 %v500_v2, %v4654_v0 }
 0x577   :  { %509 = vmax.xlane.f32.xlu0 %v508_v4  ;;  %v407_v4 = vld [vmem:[%s5197_s12 + $0x8] sm:$0xff] }
 0x578   :  { %v505_v7 = vsel %vm504_vm3, %v502_v5, -inf }
 0x579   :  { %506 = vmax.xlane.f32.xlu1 %v505_v7 }
 0x58a   :  { %527 = vrot.lane.b32.xlu1 %v4632_v57, %s4308_s28 }
 0x58d   :  { %529 = vrot.lane.b32.xlu0 %v4630_v53, %s4308_s28 }
 0x58e   :  { %620 = vrot.lane.b32.xlu1 %v4630_v53, %s4309_s6 }
 0x591   :  { %618 = vrot.lane.b32.xlu0 %v4632_v57, %s4309_s6 }
 0x595   :  { %616 = vrot.lane.b32.xlu0 %v4630_v53, %s4310_s27 }
 0x600   :  { %v510_v8 = vpop.xlane.xlu0 %509 }
 0x601   :  { %v512_v9 = vsub.f32 %v503_v3, %v510_v8 }
 0x602   :  { %v507_v10 = vpop.xlane.xlu1 %506 }
 0x603   :  { %v515_v11 = vmul.f32 1.442695, %v512_v9  ;;  %v511_v12 = vsub.f32 %v502_v5, %v507_v10  ;;  %v406_v5 = vld [vmem:[%s5197_s12] sm:$0xff] }
 0x604   :  { %v530_v14 = vpop.permute.xlu0 %529 }
 0x605   :  { %4187 = vpow2.f32 %v515_v11  ;;  %v513_v16 = vmul.f32 1.442695, %v511_v12  ;;  %3896 = vmatprep.subr.mxu1 %v530_v14 }
 0x606   :  { %3897 = vmatpush3.msra.mxu1 %v530_v14  ;;  %v528_v17 = vpop.permute.xlu1 %527 }
 0x607   :  { %4189 = vpow2.f32 %v513_v16  ;;  %3898 = vmatprep.subr.mxu1 %v528_v17 }
 0x608   :  { %3899 = vmatpush3.msra.mxu1 %v528_v17  ;;  %v619_v31 = vpop.permute.xlu0 %618 }
 0x60a   :  { %v621_v18 = vpop.permute.xlu1 %620 }
 0x60b   :  { %3903 = vmatprep.subr.msk.mxu1 %vm416_vm2, %v621_v18 }
 0x60c   :  { %v617_v32 = vpop.permute.xlu0 %616 }
 0x612   :  { %v4188_v20 = vpop.eup %4187 }
 0x613   :  { %v520_v21 = vsel %vm504_vm3, %v4188_v20, 0.0 }
 0x614   :  { %v4190_v22 = vpop.eup %4189  ;;  %521 = vadd.xlane.f32.xlu1 %v520_v21 }
 0x615   :  { %v517_v23 = vsel %vm504_vm3, %v4190_v22, 0.0 }
 0x618   :  { %518 = vadd.xlane.f32.xlu1 %v517_v23 }
 0x629   :  { %614 = vrot.lane.b32.xlu1 %v4632_v57, %s4310_s27 }
 0x69d   :  { %v522_v24 = vpop.xlane.xlu1 %521 }
 0x69e   :  { %4191 = vrcp.f32 %v522_v24 }
 0x6a1   :  { %v519_v25 = vpop.xlane.xlu1 %518 }
 0x6a2   :  { %4193 = vrcp.f32 %v519_v25 }
 0x6a5   :  { %v615_v30 = vpop.permute.xlu1 %614 }
 0x6ab   :  { %v4192_v26 = vpop.eup %4191 }
 0x6ac   :  { %v526_v29 = vmul.f32 %v4192_v26, %v4188_v20 }
 0x6af   :  { %v4194_v27 = vpop.eup %4193 }
 0x6b0   :  { %v525_v28 = vmul.f32 %v4194_v27, %v4190_v22 }
 0x6b2   :  { %3900 = vmatprep.mubr.msk.f32.mxu1 %vm504_vm3, %v525_v28 }
 0x6b3   :  { %3901 = vmatmul.mubr.msk.f32.vlgmr.msra.gmra.mxu1 %vm504_vm3, %v526_v29 }
 0x6b4   :  { %3904 = vmatpush3.xpose.msk.msra.mxu1 %vm416_vm2, %v621_v18  ;;  %3907 = vmatprep.mubr.msk.f32.mxu1 %vm416_vm2, %v615_v30 }
 0x6b5   :  { %3905 = vmatprep.subr.msk.mxu1 %vm416_vm2, %v619_v31 }
 0x6b8   :  { %3906 = vmatpush3.xpose.msk.msra.mxu1 %vm416_vm2, %v619_v31 }
 0x6bb   :  { %3908 = vmatmul.mubr.msk.f32.vlgmr.msra.gmra.mxu1 %vm416_vm2, %v617_v32 }
 0x773   :  { %v4682_v33 = vpop.f32.mrf.mxu1 }
 0x775   :  { %v605_v34 = vpop.f32.mrf.mxu1 }
 0x77b   :  { %v3909_v35 = vpop.f32.mrf.mxu1 }
 0x77c   :  { %v706_v36 = vmul.f32 0.35355338, %v3909_v35 }
 0x77d   :  { %v696_v37 = vpop.f32.mrf.mxu1 }
 0x77e   :  { %v705_v38 = vmul.f32 0.35355338, %v696_v37  ;;  %v708_v39 = vadd.f32 %v706_v36, %v4649_v61 }
 0x780   :  { %v712_v40 = vsel %vm504_vm3, %v708_v39, -inf  ;;  %v707_v41 = vadd.f32 %v705_v38, %v4654_v0 }
 0x781   :  { %713 = vmax.xlane.f32.xlu0 %v712_v40 }
 0x782   :  { %v709_v42 = vsel %vm504_vm3, %v707_v41, -inf }
 0x783   :  { %710 = vmax.xlane.f32.xlu1 %v709_v42 }
 0x80a   :  { %v714_v43 = vpop.xlane.xlu0 %713 }
 0x80b   :  { %v716_v44 = vsub.f32 %v708_v39, %v714_v43 }
 0x80c   :  { %v711_v45 = vpop.xlane.xlu1 %710 }
 0x80d   :  { %v719_v46 = vmul.f32 1.442695, %v716_v44  ;;  %v715_v47 = vsub.f32 %v707_v41, %v711_v45  ;;  %v408_v44 = vld [vmem:[%s5197_s12 + $0x10] sm:$0xff] }
 0x80f   :  { %4195 = vpow2.f32 %v719_v46  ;;  %v717_v48 = vmul.f32 1.442695, %v715_v47 }
 0x811   :  { %4197 = vpow2.f32 %v717_v48 }
 0x81c   :  { %v4196_v49 = vpop.eup %4195 }
 0x81d   :  { %v724_v50 = vsel %vm504_vm3, %v4196_v49, 0.0 }
 0x81e   :  { %v4198_v51 = vpop.eup %4197  ;;  %725 = vadd.xlane.f32.xlu1 %v724_v50 }
 0x81f   :  { %v721_v52 = vsel %vm504_vm3, %v4198_v51, 0.0 }
 0x820   :  { %722 = vadd.xlane.f32.xlu0 %v721_v52 }
 0x82f   :  { %731 = vrot.lane.b32.xlu1 %v4632_v57, %s5229_s29 }
 0x833   :  { %986 = vrot.lane.b32.xlu1 %v4630_v53, %s5227_s7 }
 0x836   :  { %733 = vrot.lane.b32.xlu0 %v4630_v53, %s5229_s29 }
 0x837   :  { %980 = vrot.lane.b32.xlu1 %v4632_v57, %s5225_s30 }
 0x83a   :  { %984 = vrot.lane.b32.xlu0 %v4632_v57, %s5227_s7 }
 0x83e   :  { %982 = vrot.lane.b32.xlu0 %v4630_v53, %s5225_s30  ;;  %s5252_s30 = smov 72  }
 0x8a7   :  { %v726_v56 = vpop.xlane.xlu1 %725 }
 0x8a8   :  { %4199 = vrcp.f32 %v726_v56 }
 0x8a9   :  { %v723_v58 = vpop.xlane.xlu0 %722 }
 0x8aa   :  { %4201 = vrcp.f32 %v723_v58 }
 0x8ab   :  { %v732_v60 = vpop.permute.xlu1 %731 }
 0x8ad   :  { %v734_v59 = vpop.permute.xlu0 %733 }
 0x8ae   :  { %3910 = vmatprep.subr.mxu1 %v734_v59 }
 0x8af   :  { %3911 = vmatpush3.msra.mxu1 %v734_v59  ;;  %v987_v8 = vpop.permute.xlu1 %986 }
 0x8b0   :  { %3912 = vmatprep.subr.mxu1 %v732_v60 }
 0x8b1   :  { %3913 = vmatpush3.msra.mxu1 %v732_v60  ;;  %v985_v11 = vpop.permute.xlu0 %984 }
 0x8b2   :  { %3917 = vmatprep.subr.mxu1 %v407_v4 }
 0x8b3   :  { %v981_v10 = vpop.permute.xlu1 %980 }
 0x8b5   :  { %v4200_v62 = vpop.eup %4199  ;;  %v983_v12 = vpop.permute.xlu0 %982 }
 0x8b6   :  { %v730_v3 = vmul.f32 %v4200_v62, %v4196_v49 }
 0x8b7   :  { %v4202_v63 = vpop.eup %4201 }
 0x8b8   :  { %v729_v2 = vmul.f32 %v4202_v63, %v4198_v51 }
 0x8ba   :  { %3914 = vmatprep.mubr.msk.f32.mxu1 %vm504_vm3, %v729_v2 }
 0x8bb   :  { %3915 = vmatmul.mubr.msk.f32.vlgmr.msra.gmra.mxu1 %vm504_vm3, %v730_v3 }
 0x8bc   :  { %3918 = vmatpush3.msra.mxu1 %v407_v4 }
 0x8bd   :  { %3922 = vmatprep.subr.mxu1 %v406_v5 }
 0x97b   :  { %v3916_v7 = vpop.f32.mrf.mxu1 }
 0x97d   :  { %v809_v9 = vpop.f32.mrf.mxu1 }
 0x97e   :  { %3919 = vmatprep.mubr.msk.f32.mxu1 %vm416_vm2, %v809_v9 }
 0x97f   :  { %3920 = vmatmul.mubr.msk.f32.vlgmr.msra.gmra.mxu1 %vm416_vm2, %v3916_v7 }
 0x980   :  { %3923 = vmatpush3.msra.mxu1 %v406_v5  ;;  %3924 = vmatprep.mubr.msk.f32.mxu1 %vm416_vm2, %v605_v34 }
 0x981   :  { %3927 = vmatprep.subr.msk.mxu1 %vm416_vm2, %v987_v8 }
 0x983   :  { %3925 = vmatmul.mubr.msk.f32.vlgmr.msra.gmra.mxu1 %vm416_vm2, %v4682_v33 }
 0x984   :  { %3928 = vmatpush3.xpose.msk.msra.mxu1 %vm416_vm2, %v987_v8  ;;  %3931 = vmatprep.mubr.msk.f32.mxu1 %vm416_vm2, %v981_v10 }
 0x985   :  { %3929 = vmatprep.subr.msk.mxu1 %vm416_vm2, %v985_v11 }
 0x988   :  { %3930 = vmatpush3.xpose.msk.msra.mxu1 %vm416_vm2, %v985_v11 }
 0x98b   :  { %3932 = vmatmul.mubr.msk.f32.vlgmr.msra.gmra.mxu1 %vm416_vm2, %v983_v12 }
 0xa3f   :  { %v3921_v14 = vpop.f32.mrf.mxu1 }
 0xa41   :  { %v890_v16 = vpop.f32.mrf.mxu1 }
 0xa43   :  { %v3926_v17 = vpop.f32.mrf.mxu1 }
 0xa44   :  { %v4721_v18 = vadd.f32 %v3926_v17, %v3921_v14 }
 0xa45   :  { %v971_v20 = vpop.f32.mrf.mxu1 }
 0xa46   :  { %v4723_v21 = vadd.f32 %v971_v20, %v890_v16 }
 0xa4b   :  { %v3933_v22 = vpop.f32.mrf.mxu1 }
 0xa4c   :  { %v1072_v23 = vmul.f32 0.35355338, %v3933_v22 }
 0xa4d   :  { %v1062_v24 = vpop.f32.mrf.mxu1 }
 0xa4e   :  { %v1071_v25 = vmul.f32 0.35355338, %v1062_v24  ;;  %v1074_v26 = vadd.f32 %v1072_v23, %v4649_v61  ;;  %v409_v24 = vld [vmem:[%s5197_s12 + $0x18] sm:$0xff] }
 0xa4f   :  { %3960 = vmatprep.subr.mxu0 %v409_v24 }
 0xa50   :  { %v1078_v27 = vsel %vm504_vm3, %v1074_v26, -inf  ;;  %v1073_v28 = vadd.f32 %v1071_v25, %v4654_v0  ;;  %3961 = vmatpush3.msra.mxu0 %v409_v24  ;;  %v1727_v24 = vld [vmem:[%s5203_s18 + $0x50] sm:$0xff] }
 0xa51   :  { %1079 = vmax.xlane.f32.xlu0 %v1078_v27 }
 0xa52   :  { %v1075_v29 = vsel %vm504_vm3, %v1073_v28, -inf }
 0xa53   :  { %1076 = vmax.xlane.f32.xlu1 %v1075_v29 }
 0xada   :  { %v1080_v30 = vpop.xlane.xlu0 %1079 }
 0xadb   :  { %v1082_v31 = vsub.f32 %v1074_v26, %v1080_v30 }
 0xadc   :  { %v1077_v32 = vpop.xlane.xlu1 %1076 }
 0xadd   :  { %v1085_v33 = vmul.f32 1.442695, %v1082_v31  ;;  %v1081_v34 = vsub.f32 %v1073_v28, %v1077_v32 }
 0xadf   :  { %4203 = vpow2.f32 %v1085_v33  ;;  %v1083_v35 = vmul.f32 1.442695, %v1081_v34 }
 0xae1   :  { %4205 = vpow2.f32 %v1083_v35  ;;  %v3625_v35 = vld [vmem:[%s5198_s13] ss:$0 sm:$0xff] }
 0xaec   :  { %v4204_v36 = vpop.eup %4203 }
 0xaed   :  { %v1090_v37 = vsel %vm504_vm3, %v4204_v36, 0.0 }
 0xaee   :  { %v4206_v38 = vpop.eup %4205  ;;  %1091 = vadd.xlane.f32.xlu1 %v1090_v37 }
 0xaef   :  { %v1087_v39 = vsel %vm504_vm3, %v4206_v38, 0.0 }
 0xaf0   :  { %1088 = vadd.xlane.f32.xlu0 %v1087_v39 }
 0xaff   :  { %1097 = vrot.lane.b32.xlu1 %v4632_v57, %s5217_s26 }
 0xb03   :  { %1273 = vrot.lane.b32.xlu1 %v4630_v53, %s5223_s3 }
 0xb06   :  { %1099 = vrot.lane.b32.xlu0 %v4630_v53, %s5217_s26 }
 0xb07   :  { %1267 = vrot.lane.b32.xlu1 %v4632_v57, %s5221_s4 }
 0xb0a   :  { %1271 = vrot.lane.b32.xlu0 %v4632_v57, %s5223_s3  ;;  %s5253_s3 = smov 104  }
 0xb0e   :  { %1269 = vrot.lane.b32.xlu0 %v4630_v53, %s5221_s4 }
 0xb77   :  { %v1092_v40 = vpop.xlane.xlu1 %1091 }
 0xb78   :  { %4207 = vrcp.f32 %v1092_v40 }
 0xb79   :  { %v1089_v41 = vpop.xlane.xlu0 %1088 }
 0xb7a   :  { %4209 = vrcp.f32 %v1089_v41 }
 0xb7b   :  { %v1098_v43 = vpop.permute.xlu1 %1097 }
 0xb7d   :  { %v1100_v42 = vpop.permute.xlu0 %1099 }
 0xb7e   :  { %3934 = vmatprep.subr.mxu1 %v1100_v42 }
 0xb7f   :  { %3935 = vmatpush3.msra.mxu1 %v1100_v42  ;;  %v1274_v49 = vpop.permute.xlu1 %1273 }
 0xb80   :  { %3936 = vmatprep.subr.mxu1 %v1098_v43 }
 0xb81   :  { %3937 = vmatpush3.msra.mxu1 %v1098_v43  ;;  %v1272_v56 = vpop.permute.xlu0 %1271 }
 0xb82   :  { %3941 = vmatprep.subr.mxu1 %v408_v44 }
 0xb83   :  { %v1268_v52 = vpop.permute.xlu1 %1267 }
 0xb85   :  { %v4208_v45 = vpop.eup %4207  ;;  %v1270_v58 = vpop.permute.xlu0 %1269 }
 0xb86   :  { %v1096_v48 = vmul.f32 %v4208_v45, %v4204_v36 }
 0xb87   :  { %v4210_v46 = vpop.eup %4209 }
 0xb88   :  { %v1095_v47 = vmul.f32 %v4210_v46, %v4206_v38 }
 0xb8a   :  { %3938 = vmatprep.mubr.msk.f32.mxu1 %vm504_vm3, %v1095_v47 }
 0xb8b   :  { %3939 = vmatmul.mubr.msk.f32.vlgmr.msra.gmra.mxu1 %vm504_vm3, %v1096_v48 }
 0xb8c   :  { %3942 = vmatpush3.msra.mxu1 %v408_v44 }
 0xb8d   :  { %3946 = vmatprep.subr.msk.mxu1 %vm416_vm2, %v1274_v49 }
 0xc4b   :  { %v3940_v50 = vpop.f32.mrf.mxu1 }
 0xc4d   :  { %v1175_v51 = vpop.f32.mrf.mxu1 }
 0xc4e   :  { %3943 = vmatprep.mubr.msk.f32.mxu1 %vm416_vm2, %v1175_v51 }
 0xc4f   :  { %3944 = vmatmul.mubr.msk.f32.vlgmr.msra.gmra.mxu1 %vm416_vm2, %v3940_v50 }
 0xc50   :  { %3947 = vmatpush3.xpose.msk.msra.mxu1 %vm416_vm2, %v1274_v49  ;;  %3950 = vmatprep.mubr.msk.f32.mxu1 %vm416_vm2, %v1268_v52  ;;  %v1612_v52 = vld [vmem:[%s5201_s16 + $0x18] sm:$0xff] }
 0xc51   :  { %3948 = vmatprep.subr.msk.mxu1 %vm416_vm2, %v1272_v56 }
 0xc54   :  { %3949 = vmatpush3.xpose.msk.msra.mxu1 %vm416_vm2, %v1272_v56  ;;  %v1611_v56 = vld [vmem:[%s5201_s16 + $0x10] sm:$0xff] }
 0xc57   :  { %3951 = vmatmul.mubr.msk.f32.vlgmr.msra.gmra.mxu1 %vm416_vm2, %v1270_v58  ;;  %v1610_v58 = vld [vmem:[%s5201_s16 + $0x8] sm:$0xff] }
 0xd0f   :  { %v3945_v59 = vpop.f32.mrf.mxu1 }
 0xd10   :  { %v1266_v60 = vadd.f32 %v3945_v59, %v4721_v18  ;;  %v1609_v59 = vld [vmem:[%s5201_s16] sm:$0xff] }
 0xd11   :  { %v1256_v62 = vpop.f32.mrf.mxu1 }
 0xd12   :  { %v1265_v63 = vadd.f32 %v1256_v62, %v4723_v21 }
 0xd17   :  { %v3952_v2 = vpop.f32.mrf.mxu1 }
 0xd18   :  { %v1359_v3 = vmul.f32 0.35355338, %v3952_v2 }
 0xd19   :  { %v1349_v4 = vpop.f32.mrf.mxu1 }
 0xd1a   :  { %v1358_v5 = vmul.f32 0.35355338, %v1349_v4  ;;  %v1361_v7 = vadd.f32 %v1359_v3, %v4649_v61 }
 0xd1c   :  { %v1365_v8 = vsel %vm504_vm3, %v1361_v7, -inf  ;;  %v1360_v9 = vadd.f32 %v1358_v5, %v4654_v0 }
 0xd1d   :  { %1366 = vmax.xlane.f32.xlu0 %v1365_v8 }
 0xd1e   :  { %v1362_v10 = vsel %vm504_vm3, %v1360_v9, -inf }
 0xd1f   :  { %1363 = vmax.xlane.f32.xlu1 %v1362_v10 }
 0xda6   :  { %v1367_v11 = vpop.xlane.xlu0 %1366 }
 0xda7   :  { %v1369_v12 = vsub.f32 %v1361_v7, %v1367_v11  ;;  %v3626_v7 = vld [vmem:[%s5199_s14] ss:$0 sm:$0xff] }
 0xda8   :  { %v1364_v14 = vpop.xlane.xlu1 %1363 }
 0xda9   :  { %v1372_v16 = vmul.f32 1.442695, %v1369_v12  ;;  %v1368_v17 = vsub.f32 %v1360_v9, %v1364_v14  ;;  %v3627_v12 = vld [vmem:[%s5200_s15] ss:$0 sm:$0xff] }
 0xdab   :  { %4211 = vpow2.f32 %v1372_v16  ;;  %v1370_v18 = vmul.f32 1.442695, %v1368_v17 }
 0xdad   :  { %4213 = vpow2.f32 %v1370_v18  ;;  %v1732_v18 = vld [vmem:[%s5203_s18 + $0x78] sm:$0xff] }
 0xdae   :  { %3976 = vmatprep.subr.mxu0 %v1732_v18 }
 0xdb8   :  { %v4212_v20 = vpop.eup %4211 }
 0xdb9   :  { %v1377_v21 = vsel %vm504_vm3, %v4212_v20, 0.0 }
 0xdba   :  { %v4214_v22 = vpop.eup %4213  ;;  %1378 = vadd.xlane.f32.xlu1 %v1377_v21  ;;  %v1730_v21 = vld [vmem:[%s5203_s18 + $0x68] sm:$0xff] }
 0xdbb   :  { %v1374_v23 = vsel %vm504_vm3, %v4214_v22, 0.0 }
 0xdbc   :  { %1375 = vadd.xlane.f32.xlu0 %v1374_v23  ;;  %v1728_v23 = vld [vmem:[%s5203_s18 + $0x58] sm:$0xff] }
 0xdcb   :  { %1384 = vrot.lane.b32.xlu1 %v4632_v57, %s5219_s8 }
 0xdd2   :  { %1386 = vrot.lane.b32.xlu0 %v4630_v53, %s5219_s8  ;;  %s5255_s8 = smov 40  }
 0xe43   :  { %v1379_v25 = vpop.xlane.xlu1 %1378 }
 0xe44   :  { %4215 = vrcp.f32 %v1379_v25  ;;  %v1726_v25 = vld [vmem:[%s5203_s18 + $0x48] sm:$0xff] }
 0xe45   :  { %v1376_v26 = vpop.xlane.xlu0 %1375 }
 0xe46   :  { %4217 = vrcp.f32 %v1376_v26  ;;  %v1725_v26 = vld [vmem:[%s5203_s18 + $0x40] sm:$0xff] }
 0xe47   :  { %v1385_v28 = vpop.permute.xlu1 %1384 }
 0xe49   :  { %v1387_v27 = vpop.permute.xlu0 %1386 }
 0xe4a   :  { %3953 = vmatprep.subr.mxu1 %v1387_v27 }
 0xe4b   :  { %3954 = vmatpush3.msra.mxu1 %v1387_v27  ;;  %v1724_v27 = vld [vmem:[%s5203_s18 + $0x38] sm:$0xff] }
 0xe4c   :  { %3955 = vmatprep.subr.mxu1 %v1385_v28 }
 0xe4d   :  { %3956 = vmatpush3.msra.mxu1 %v1385_v28  ;;  %v1723_v28 = vld [vmem:[%s5203_s18 + $0x30] sm:$0xff] }
 0xe4e   :  { %3965 = vmatprep.subr.mxu1 %v1612_v52 }
 0xe51   :  { %v4216_v57 = vpop.eup %4215 }
 0xe52   :  { %v1383_v53 = vmul.f32 %v4216_v57, %v4212_v20  ;;  %v1731_v20 = vld [vmem:[%s5203_s18 + $0x70] sm:$0xff]  ;;  %v1722_v57 = vld [vmem:[%s5203_s18 + $0x28] sm:$0xff] }
 0xe53   :  { %v4218_v29 = vpop.eup %4217 }
 0xe54   :  { %v1382_v30 = vmul.f32 %v4218_v29, %v4214_v22  ;;  %v1729_v22 = vld [vmem:[%s5203_s18 + $0x60] sm:$0xff] }
 0xe55   :  { %v1721_v29 = vld [vmem:[%s5203_s18 + $0x20] sm:$0xff] }
 0xe56   :  { %3957 = vmatprep.mubr.msk.f32.mxu1 %vm504_vm3, %v1382_v30  ;;  %v1720_v30 = vld [vmem:[%s5203_s18 + $0x18] sm:$0xff] }
 0xe57   :  { %3958 = vmatmul.mubr.msk.f32.vlgmr.msra.gmra.mxu1 %vm504_vm3, %v1383_v53  ;;  %v1719_v53 = vld [vmem:[%s5203_s18 + $0x10] sm:$0xff] }
 0xe58   :  { %3966 = vmatpush3.msra.mxu1 %v1612_v52 }
 0xe59   :  { %3967 = vmatprep.subr.mxu1 %v1611_v56 }
 0xe5a   :  { %3968 = vmatpush3.msra.mxu1 %v1611_v56  ;;  %v3635_v56 = vld [vmem:[%s5246_s0 + $0x18] sm:$0xff] }
 0xe5b   :  { %3969 = vmatprep.subr.mxu1 %v1610_v58 }
 0xe5c   :  { %3970 = vmatpush3.msra.mxu1 %v1610_v58 }
 0xe5d   :  { %3971 = vmatprep.subr.mxu1 %v1609_v59 }
 0xe5e   :  { %3972 = vmatpush3.msra.mxu1 %v1609_v59 }
 0xf17   :  { %v3959_v31 = vpop.f32.mrf.mxu1 }
 0xf19   :  { %v1462_v32 = vpop.f32.mrf.mxu1 }
 0xf1a   :  { %3962 = vmatprep.mubr.msk.f32.mxu0 %vm416_vm2, %v1462_v32  ;;  %v1717_v32 = vld [vmem:[%s5203_s18] sm:$0xff] }
 0xf1b   :  { %3963 = vmatmul.mubr.msk.f32.vlgmr.msra.gmra.mxu0 %vm416_vm2, %v3959_v31  ;;  %v1718_v31 = vld [vmem:[%s5203_s18 + $0x8] sm:$0xff] }
 0xf1c   :  { %3977 = vmatpush3.msra.mxu0 %v1732_v18  ;;  %v3642_v18 = vld [vmem:[%s5195_s10 + $0x30] sm:$0xff] }
 0xf1d   :  { %3978 = vmatprep.subr.mxu0 %v1731_v20 }
 0xf1e   :  { %3979 = vmatpush3.msra.mxu0 %v1731_v20  ;;  %v3641_v20 = vld [vmem:[%s5195_s10 + $0x28] sm:$0xff] }
 0xf1f   :  { %3980 = vmatprep.subr.mxu0 %v1730_v21 }
 0xf20   :  { %3981 = vmatpush3.msra.mxu0 %v1730_v21  ;;  %v3640_v21 = vld [vmem:[%s5195_s10 + $0x20] sm:$0xff] }
 0xf21   :  { %3982 = vmatprep.subr.mxu0 %v1729_v22 }
 0xf22   :  { %3983 = vmatpush3.msra.mxu0 %v1729_v22 }
 0xf23   :  { %3984 = vmatprep.subr.mxu0 %v1728_v23 }
 0xf24   :  { %3985 = vmatpush3.msra.mxu0 %v1728_v23 }
 0xf25   :  { %3986 = vmatprep.subr.mxu0 %v1727_v24 }
 0xf26   :  { %3987 = vmatpush3.msra.mxu0 %v1727_v24 }
 0xf27   :  { %3988 = vmatprep.subr.mxu0 %v1726_v25 }
 0xf28   :  { %3989 = vmatpush3.msra.mxu0 %v1726_v25 }
 0xf29   :  { %3990 = vmatprep.subr.mxu0 %v1725_v26 }
 0xf2a   :  { %3991 = vmatpush3.msra.mxu0 %v1725_v26 }
 0xf2b   :  { %3992 = vmatprep.subr.mxu0 %v1724_v27 }
 0xf2c   :  { %3993 = vmatpush3.msra.mxu0 %v1724_v27 }
 0xf2d   :  { %3994 = vmatprep.subr.mxu0 %v1723_v28 }
 0xf2e   :  { %3995 = vmatpush3.msra.mxu0 %v1723_v28 }
 0xf2f   :  { %3996 = vmatprep.subr.mxu0 %v1722_v57 }
 0xf30   :  { %3997 = vmatpush3.msra.mxu0 %v1722_v57  ;;  %v3638_v57 = vld [vmem:[%s5247_s2 + $0x1] ss:$0 sm:$0xff] }
 0xf31   :  { %3998 = vmatprep.subr.mxu0 %v1721_v29 }
 0xf32   :  { %3999 = vmatpush3.msra.mxu0 %v1721_v29 }
 0xf33   :  { %4000 = vmatprep.subr.mxu0 %v1720_v30 }
 0xf34   :  { %4001 = vmatpush3.msra.mxu0 %v1720_v30 }
 0xf35   :  { %4002 = vmatprep.subr.mxu0 %v1719_v53 }
 0xf36   :  { %4003 = vmatpush3.msra.mxu0 %v1719_v53 }
 0xf37   :  { %4004 = vmatprep.subr.mxu0 %v1718_v31 }
 0xf38   :  { %4005 = vmatpush3.msra.mxu0 %v1718_v31 }
 0xf39   :  { %4006 = vmatprep.subr.mxu0 %v1717_v32 }
 0xf3a   :  { %4007 = vmatpush3.msra.mxu0 %v1717_v32  ;;  %v3639_v32 = vld [vmem:[%s5194_s9 + $0x1] ss:$0 sm:$0xff] }
 0xfdb   :  { %v3964_v33 = vpop.f32.mrf.mxu0 }
 0xfdc   :  { %v1553_v34 = vadd.f32 %v3964_v33, %v1266_v60  ;;  %v3628_v33 = vld [vmem:[%s5202_s17] ss:$0 sm:$0xff] }
 0xfdd   :  { %v1543_v36 = vpop.f32.mrf.mxu0 }
 0xfde   :  { %v1555_v37 = vadd.f32 %v1553_v34, %v4599_v19  ;;  %v1552_v38 = vadd.f32 %v1543_v36, %v1265_v63 }
 0xfe0   :  { %v4779_v39 = vadd.f32 %v3625_v35, %v1555_v37  ;;  %v1554_v40 = vadd.f32 %v1552_v38, %v4593_v15 }
 0xfe2   :  { %v4782_v41 = vadd.f32 %v3625_v35, %v1554_v40  ;;  %v1570_v42 = vsel %vm192_vm1, %v4779_v39, 0.0 }
 0xfe3   :  { %1571 = vadd.xlane.f32.xlu0 %v1570_v42 }
 0xfe4   :  { %v1567_v43 = vsel %vm192_vm1, %v4782_v41, 0.0 }
 0xfe5   :  { %1568 = vadd.xlane.f32.xlu1 %v1567_v43 }
0x106c   :  { %v1572_v44 = vpop.xlane.xlu0 %1571 }
0x106d   :  { %v1574_v45 = vmul.f32 0.03125, %v1572_v44 }
0x106e   :  { %v1569_v46 = vpop.xlane.xlu1 %1568 }
0x106f   :  { %v1576_v19 = vsub.f32 %v4779_v39, %v1574_v45  ;;  %v1573_v47 = vmul.f32 0.03125, %v1569_v46 }
0x1071   :  { %v1575_v48 = vsub.f32 %v4782_v41, %v1573_v47  ;;  %v1578_v49 = vmul.f32 %v1576_v19, %v1576_v19 }
0x1073   :  { %v1582_v15 = vsel %vm192_vm1, %v1578_v49, 0.0  ;;  %v1577_v50 = vmul.f32 %v1575_v48, %v1575_v48 }
0x1074   :  { %1583 = vadd.xlane.f32.xlu1 %v1582_v15 }
0x1075   :  { %v1579_v51 = vsel %vm192_vm1, %v1577_v50, 0.0 }
0x1076   :  { %1580 = vadd.xlane.f32.xlu0 %v1579_v51  ;;  %v3633_v51 = vld [vmem:[%s5204_s19] ss:$0 sm:$0xff] }
0x10fd   :  { %v1584_v60 = vpop.xlane.xlu1 %1583 }
0x10fe   :  { %v1586_v62 = vmul.f32 0.03125, %v1584_v60 }
0x10ff   :  { %v1581_v63 = vpop.xlane.xlu0 %1580 }
0x1100   :  { %v1588_v2 = vadd.f32 1e-05, %v1586_v62  ;;  %v1585_v3 = vmul.f32 0.03125, %v1581_v63  ;;  %v3634_v62 = vld [vmem:[%s5246_s0 + $0x10] sm:$0xff]  ;;  %v1825_v63 = vmul.f32 %v3635_v56, %v4591_v13  ;;  %s5254_s0 = smov 48  }
0x1102   :  { %4219 = vrsqrt.f32 %v1588_v2  ;;  %v1587_v4 = vadd.f32 1e-05, %v1585_v3 }
0x1104   :  { %4221 = vrsqrt.f32 %v1587_v4  ;;  %v1824_v4 = vmul.f32 %v3634_v62, %v4571_v54 }
0x110f   :  { %v4220_v5 = vpop.eup %4219 }
0x1110   :  { %v1592_v8 = vmul.f32 %v4220_v5, %v1576_v19 }
0x1111   :  { %v4222_v9 = vpop.eup %4221 }
0x1112   :  { %v1591_v10 = vmul.f32 %v4222_v9, %v1575_v48  ;;  %v1600_v11 = vmul.f32 %v3626_v7, %v1592_v8 }
0x1114   :  { %v1599_v14 = vmul.f32 %v3626_v7, %v1591_v10  ;;  %v1608_v17 = vadd.f32 %v3627_v12, %v1600_v11 }
0x1116   :  { %v1607_v16 = vadd.f32 %v3627_v12, %v1599_v14 }
0x1118   :  { %3973 = vmatprep.mubr.msk.f32.mxu1 %vm192_vm1, %v1607_v16 }
0x1119   :  { %3974 = vmatmul.mubr.msk.f32.vlgmr.msra.gmra.mxu1 %vm192_vm1, %v1608_v17  ;;  %v3643_v17 = vld [vmem:[%s5195_s10 + $0x38] sm:$0xff] }
0x111a   :  { %4011 = vmatprep.subr.mxu1 %v3643_v17 }
0x111b   :  { %4012 = vmatpush3.msra.mxu1 %v3643_v17 }
0x111c   :  { %4013 = vmatprep.subr.mxu1 %v3642_v18 }
0x111d   :  { %4014 = vmatpush3.msra.mxu1 %v3642_v18 }
0x111e   :  { %4015 = vmatprep.subr.mxu1 %v3641_v20 }
0x111f   :  { %4016 = vmatpush3.msra.mxu1 %v3641_v20  ;;  %v4960_v20 = vld [vmem:[%s5248_s1 + $0x8] sm:$0xff] }
0x1120   :  { %4017 = vmatprep.subr.mxu1 %v3640_v21 }
0x1121   :  { %4018 = vmatpush3.msra.mxu1 %v3640_v21 }
0x11d9   :  { %v3975_v34 = vpop.f32.mrf.mxu1 }
0x11da   :  { %v1698_v35 = vadd.f32 %v3975_v34, %v3628_v33 }
0x11db   :  { %v1692_v36 = vpop.f32.mrf.mxu1 }
0x11dc   :  { %v3632_v37 = vmul.f32 -1.702, %v1698_v35  ;;  %v1693_v38 = vadd.f32 %v3628_v33, %v1692_v36  ;;  %v3645_v36 = vld [vmem:[%s5196_s11 + $0x1] ss:$0 sm:$0xff] }
0x11de   :  { %v1707_v40 = vmul.f32 1.442695, %v3632_v37  ;;  %v3631_v42 = vmul.f32 -1.702, %v1693_v38 }
0x11e0   :  { %4223 = vpow2.f32 %v1707_v40  ;;  %v1705_v43 = vmul.f32 1.442695, %v3631_v42 }
0x11e2   :  { %4225 = vpow2.f32 %v1705_v43 }
0x11ed   :  { %v4224_v44 = vpop.eup %4223 }
0x11ee   :  { %v1710_v45 = vadd.f32 1.0, %v4224_v44 }
0x11ef   :  { %v4226_v46 = vpop.eup %4225 }
0x11f0   :  { %v1709_v19 = vadd.f32 1.0, %v4226_v46  ;;  %4227 = vrcp.f32 %v1710_v45 }
0x11f2   :  { %4229 = vrcp.f32 %v1709_v19 }
0x11fd   :  { %v4228_v47 = vpop.eup %4227 }
0x11fe   :  { %v1716_v15 = vmul.f32 %v4228_v47, %v1698_v35 }
0x11ff   :  { %v4230_v48 = vpop.eup %4229 }
0x1200   :  { %v1715_v49 = vmul.f32 %v4230_v48, %v1693_v38 }
0x1202   :  { %4008 = vmatprep.mubr.f32.mxu0 %v1715_v49 }
0x1203   :  { %4009 = vmatmul.mubr.f32.vlgmr.msra.gmra.mxu0 %v1716_v15 }
0x12c3   :  { %v4010_v50 = vpop.f32.mrf.mxu0 }
0x12c4   :  { %v1809_v52 = vadd.f32 %v4010_v50, %v4779_v39 }
0x12c5   :  { %v1799_v58 = vpop.f32.mrf.mxu0 }
0x12c6   :  { %v1818_v59 = vadd.f32 %v3633_v51, %v1809_v52  ;;  %v1808_v60 = vadd.f32 %v1799_v58, %v4782_v41 }
0x12c8   :  { %v1820_v2 = vmul.f32 %v1818_v59, %v4573_v55  ;;  %v1817_v3 = vadd.f32 %v3633_v51, %v1808_v60 }
0x12ca   :  { %v1819_v39 = vmul.f32 %v1817_v3, %v4584_v6  ;;  %v4878_v5 = vadd.f32 %v1825_v63, %v1820_v2 }
0x12cc   :  { %v1835_v7 = vsel %vm192_vm1, %v4878_v5, 0.0  ;;  %v4882_v8 = vadd.f32 %v1824_v4, %v1819_v39 }
0x12cd   :  { %1836 = vadd.xlane.f32.xlu1 %v1835_v7 }
0x12ce   :  { %v1832_v41 = vsel %vm192_vm1, %v4882_v8, 0.0 }
0x12cf   :  { %1833 = vadd.xlane.f32.xlu0 %v1832_v41 }
0x1356   :  { %v1837_v13 = vpop.xlane.xlu1 %1836 }
0x1357   :  { %v1839_v9 = vmul.f32 0.03125, %v1837_v13 }
0x1358   :  { %v1834_v55 = vpop.xlane.xlu0 %1833 }
0x1359   :  { %v1841_v10 = vsub.f32 %v4878_v5, %v1839_v9  ;;  %v1838_v54 = vmul.f32 0.03125, %v1834_v55 }
0x135b   :  { %v1840_v6 = vsub.f32 %v4882_v8, %v1838_v54  ;;  %v1843_v11 = vmul.f32 %v1841_v10, %v1841_v10 }
0x135d   :  { %v1847_v12 = vsel %vm192_vm1, %v1843_v11, 0.0  ;;  %v1842_v14 = vmul.f32 %v1840_v6, %v1840_v6 }
0x135e   :  { %1848 = vadd.xlane.f32.xlu1 %v1847_v12 }
0x135f   :  { %v1844_v16 = vsel %vm192_vm1, %v1842_v14, 0.0 }
0x1360   :  { %1845 = vadd.xlane.f32.xlu0 %v1844_v16 }
0x13e7   :  { %v1849_v22 = vpop.xlane.xlu1 %1848 }
0x13e8   :  { %v1851_v23 = vmul.f32 0.03125, %v1849_v22 }
0x13e9   :  { %v1846_v24 = vpop.xlane.xlu0 %1845 }
0x13ea   :  { %v1853_v25 = vadd.f32 1e-05, %v1851_v23  ;;  %v1850_v26 = vmul.f32 0.03125, %v1846_v24  ;;  %v4967_v23 = vld [vmem:[%s5248_s1] sm:$0xff] }
0x13ec   :  { %4231 = vrsqrt.f32 %v1853_v25  ;;  %v1852_v27 = vadd.f32 1e-05, %v1850_v26 }
0x13ee   :  { %4233 = vrsqrt.f32 %v1852_v27 }
0x13f9   :  { %v4232_v28 = vpop.eup %4231 }
0x13fa   :  { %v1857_v29 = vmul.f32 %v4232_v28, %v1841_v10 }
0x13fb   :  { %v4234_v30 = vpop.eup %4233 }
0x13fc   :  { %v1856_v53 = vmul.f32 %v4234_v30, %v1840_v6  ;;  %v1865_v31 = vmul.f32 %v3638_v57, %v1857_v29 }
0x13fe   :  { %v1864_v33 = vmul.f32 %v3638_v57, %v1856_v53  ;;  %v1873_v35 = vadd.f32 %v3639_v32, %v1865_v31 }
0x1400   :  { %v1872_v34 = vadd.f32 %v3639_v32, %v1864_v33 }
0x1402   :  { %4019 = vmatprep.mubr.msk.f32.mxu1 %vm192_vm1, %v1872_v34  ;;  %v3649_v34 = vld [vmem:[%s5197_s12 + $0x28] sm:$0xff] }
0x1403   :  { %4020 = vmatmul.mubr.msk.f32.vlgmr.msra.gmra.mxu1 %vm192_vm1, %v1873_v35 }
0x14c3   :  { %v4021_v37 = vpop.f32.mrf.mxu1 }
0x14c4   :  { %v4913_v38 = vadd.f32 %v4021_v37, %v3645_v36 }
0x14c5   :  { %v1959_v40 = vpop.f32.mrf.mxu1 }
0x14c6   :  { %v4915_v42 = vadd.f32 %v3645_v36, %v1959_v40  ;;  %1977 = vrot.lane.b32.xlu0 %v4913_v38, %s4307_s25 }
0x14c8   :  { %1975 = vrot.lane.b32.xlu1 %v4915_v42, %s4307_s25  ;;  %4026 = vmatprep.mubr.msk.f32.mxu1 %vm416_vm2, %v4915_v42 }
0x1538   :  { %v1978_v43 = vpop.permute.xlu0 %1977 }
0x1539   :  { %4022 = vmatprep.subr.msk.mxu1 %vm416_vm2, %v1978_v43 }
0x153a   :  { %4023 = vmatpush3.xpose.msk.msra.mxu1 %vm416_vm2, %v1978_v43  ;;  %v1976_v44 = vpop.permute.xlu1 %1975 }
0x153b   :  { %4024 = vmatprep.subr.msk.mxu1 %vm416_vm2, %v1976_v44 }
0x153e   :  { %4025 = vmatpush3.xpose.msk.msra.mxu1 %vm416_vm2, %v1976_v44  ;;  %v3648_v44 = vld [vmem:[%s5197_s12 + $0x20] sm:$0xff] }
0x1541   :  { %4027 = vmatmul.mubr.msk.f32.vlgmr.msra.gmra.mxu1 %vm416_vm2, %v4913_v38 }
0x1601   :  { %v4028_v45 = vpop.f32.mrf.mxu1 }
0x1602   :  { %v2063_v46 = vmul.f32 0.35355338, %v4028_v45 }
0x1603   :  { %v2053_v19 = vpop.f32.mrf.mxu1 }
0x1604   :  { %v2062_v47 = vmul.f32 0.35355338, %v2053_v19  ;;  %v2065_v48 = vadd.f32 %v2063_v46, %v4649_v61 }
0x1606   :  { %v2069_v49 = vsel %vm504_vm3, %v2065_v48, -inf  ;;  %v2064_v15 = vadd.f32 %v2062_v47, %v4654_v0 }
0x1607   :  { %2070 = vmax.xlane.f32.xlu0 %v2069_v49 }
0x1608   :  { %v2066_v50 = vsel %vm504_vm3, %v2064_v15, -inf }
0x1609   :  { %2067 = vmax.xlane.f32.xlu1 %v2066_v50 }
0x1690   :  { %v2071_v51 = vpop.xlane.xlu0 %2070 }
0x1691   :  { %v2073_v52 = vsub.f32 %v2065_v48, %v2071_v51 }
0x1692   :  { %v2068_v56 = vpop.xlane.xlu1 %2067 }
0x1693   :  { %v2076_v58 = vmul.f32 1.442695, %v2073_v52  ;;  %v2072_v59 = vsub.f32 %v2064_v15, %v2068_v56 }
0x1695   :  { %4235 = vpow2.f32 %v2076_v58  ;;  %v2074_v60 = vmul.f32 1.442695, %v2072_v59 }
0x1697   :  { %4237 = vpow2.f32 %v2074_v60 }
0x16a2   :  { %v4236_v62 = vpop.eup %4235 }
0x16a3   :  { %v2081_v63 = vsel %vm504_vm3, %v4236_v62, 0.0 }
0x16a4   :  { %v4238_v61 = vpop.eup %4237  ;;  %2082 = vadd.xlane.f32.xlu1 %v2081_v63 }
0x16a5   :  { %v2078_v2 = vsel %vm504_vm3, %v4238_v61, 0.0 }
0x16a6   :  { %2079 = vadd.xlane.f32.xlu0 %v2078_v2 }
0x16b5   :  { %2088 = vrot.lane.b32.xlu1 %v4915_v42, %s4308_s28 }
0x16b9   :  { %2181 = vrot.lane.b32.xlu1 %v4913_v38, %s4309_s6 }
0x16bc   :  { %2090 = vrot.lane.b32.xlu0 %v4913_v38, %s4308_s28 }
0x16bd   :  { %2175 = vrot.lane.b32.xlu1 %v4915_v42, %s4310_s27 }
0x16c0   :  { %2179 = vrot.lane.b32.xlu0 %v4915_v42, %s4309_s6  ;;  %s5249_s6 = smov 56  }
0x16c4   :  { %2177 = vrot.lane.b32.xlu0 %v4913_v38, %s4310_s27  ;;  %s5250_s27 = smov 80  }
0x172d   :  { %v2083_v0 = vpop.xlane.xlu1 %2082 }
0x172e   :  { %4239 = vrcp.f32 %v2083_v0 }
0x172f   :  { %v2080_v3 = vpop.xlane.xlu0 %2079 }
0x1730   :  { %4241 = vrcp.f32 %v2080_v3 }
0x1731   :  { %v2089_v4 = vpop.permute.xlu1 %2088 }
0x1733   :  { %v2091_v39 = vpop.permute.xlu0 %2090 }
0x1734   :  { %4029 = vmatprep.subr.mxu1 %v2091_v39 }
0x1735   :  { %4030 = vmatpush3.msra.mxu1 %v2091_v39  ;;  %v2182_v7 = vpop.permute.xlu1 %2181 }
0x1736   :  { %4031 = vmatprep.subr.mxu1 %v2089_v4 }
0x1737   :  { %4032 = vmatpush3.msra.mxu1 %v2089_v4  ;;  %v2180_v54 = vpop.permute.xlu0 %2179 }
0x1738   :  { %4036 = vmatprep.subr.msk.mxu1 %vm416_vm2, %v2182_v7 }
0x1739   :  { %v2176_v10 = vpop.permute.xlu1 %2175 }
0x173b   :  { %v4240_v41 = vpop.eup %4239  ;;  %v2178_v6 = vpop.permute.xlu0 %2177 }
0x173c   :  { %v2087_v55 = vmul.f32 %v4240_v41, %v4236_v62 }
0x173d   :  { %v4242_v13 = vpop.eup %4241 }
0x173e   :  { %v2086_v9 = vmul.f32 %v4242_v13, %v4238_v61 }
0x1740   :  { %4033 = vmatprep.mubr.msk.f32.mxu1 %vm504_vm3, %v2086_v9 }
0x1741   :  { %4034 = vmatmul.mubr.msk.f32.vlgmr.msra.gmra.mxu1 %vm504_vm3, %v2087_v55 }
0x1742   :  { %4037 = vmatpush3.xpose.msk.msra.mxu1 %vm416_vm2, %v2182_v7  ;;  %4040 = vmatprep.mubr.msk.f32.mxu1 %vm416_vm2, %v2176_v10 }
0x1743   :  { %4038 = vmatprep.subr.msk.mxu1 %vm416_vm2, %v2180_v54 }
0x1746   :  { %4039 = vmatpush3.xpose.msk.msra.mxu1 %vm416_vm2, %v2180_v54 }
0x1747   :  { %4050 = vmatprep.subr.mxu1 %v3649_v34 }
0x1749   :  { %4041 = vmatmul.mubr.msk.f32.vlgmr.msra.gmra.mxu1 %vm416_vm2, %v2178_v6 }
0x174a   :  { %4051 = vmatpush3.msra.mxu1 %v3649_v34 }
0x1801   :  { %v4955_v11 = vpop.f32.mrf.mxu1 }
0x1803   :  { %v2166_v12 = vpop.f32.mrf.mxu1 }
0x1809   :  { %v4042_v14 = vpop.f32.mrf.mxu1 }
0x180a   :  { %v2267_v16 = vmul.f32 0.35355338, %v4042_v14 }
0x180b   :  { %v2257_v17 = vpop.f32.mrf.mxu1 }
0x180c   :  { %v2266_v18 = vmul.f32 0.35355338, %v2257_v17  ;;  %v2269_v21 = vadd.f32 %v4960_v20, %v2267_v16 }
0x180e   :  { %v2273_v22 = vsel %vm504_vm3, %v2269_v21, -inf  ;;  %v2268_v24 = vadd.f32 %v4967_v23, %v2266_v18 }
0x180f   :  { %2274 = vmax.xlane.f32.xlu0 %v2273_v22 }
0x1810   :  { %v2270_v25 = vsel %vm504_vm3, %v2268_v24, -inf }
0x1811   :  { %2271 = vmax.xlane.f32.xlu1 %v2270_v25 }
0x1898   :  { %v2275_v26 = vpop.xlane.xlu0 %2274 }
0x1899   :  { %v2277_v27 = vsub.f32 %v2269_v21, %v2275_v26 }
0x189a   :  { %v2272_v28 = vpop.xlane.xlu1 %2271 }
0x189b   :  { %v2280_v57 = vmul.f32 1.442695, %v2277_v27  ;;  %v2276_v29 = vsub.f32 %v2268_v24, %v2272_v28 }
0x189d   :  { %4243 = vpow2.f32 %v2280_v57  ;;  %v2278_v30 = vmul.f32 1.442695, %v2276_v29 }
0x189f   :  { %4245 = vpow2.f32 %v2278_v30 }
0x18aa   :  { %v4244_v53 = vpop.eup %4243 }
0x18ab   :  { %v2285_v31 = vsel %vm504_vm3, %v4244_v53, 0.0 }
0x18ac   :  { %v4246_v32 = vpop.eup %4245  ;;  %2286 = vadd.xlane.f32.xlu1 %v2285_v31 }
0x18ad   :  { %v2282_v33 = vsel %vm504_vm3, %v4246_v32, 0.0 }
0x18ae   :  { %2283 = vadd.xlane.f32.xlu0 %v2282_v33 }
0x18bd   :  { %2292 = vrot.lane.b32.xlu1 %v4915_v42, %s5249_s6 }
0x18c1   :  { %2547 = vrot.lane.b32.xlu1 %v4913_v38, %s5250_s27 }
0x18c4   :  { %2294 = vrot.lane.b32.xlu0 %v4913_v38, %s5249_s6 }
0x18c5   :  { %2541 = vrot.lane.b32.xlu1 %v4915_v42, %s5251_s5 }
0x18c8   :  { %2545 = vrot.lane.b32.xlu0 %v4915_v42, %s5250_s27 }
0x18c9   :  { %2834 = vrot.lane.b32.xlu1 %v4913_v38, %s5252_s30 }
0x18cc   :  { %2543 = vrot.lane.b32.xlu0 %v4913_v38, %s5251_s5 }
0x18cd   :  { %2828 = vrot.lane.b32.xlu1 %v4915_v42, %s5253_s3 }
0x18d0   :  { %2832 = vrot.lane.b32.xlu0 %v4915_v42, %s5252_s30 }
0x18d4   :  { %2830 = vrot.lane.b32.xlu0 %v4913_v38, %s5253_s3 }
0x1935   :  { %v2287_v35 = vpop.xlane.xlu1 %2286 }
0x1936   :  { %4247 = vrcp.f32 %v2287_v35 }
0x1937   :  { %v2284_v36 = vpop.xlane.xlu0 %2283 }
0x1938   :  { %4249 = vrcp.f32 %v2284_v36 }
0x1939   :  { %v2293_v37 = vpop.permute.xlu1 %2292 }
0x193b   :  { %v2295_v40 = vpop.permute.xlu0 %2294 }
0x193c   :  { %4043 = vmatprep.subr.mxu0 %v2295_v40 }
0x193d   :  { %4044 = vmatpush3.msra.mxu0 %v2295_v40  ;;  %v2548_v43 = vpop.permute.xlu1 %2547 }
0x193e   :  { %4045 = vmatprep.subr.mxu0 %v2293_v37  ;;  %4060 = vmatprep.subr.msk.mxu1 %vm416_vm2, %v2548_v43 }
0x193f   :  { %4046 = vmatpush3.msra.mxu0 %v2293_v37  ;;  %v2546_v15 = vpop.permute.xlu0 %2545 }
0x1940   :  { %4055 = vmatprep.subr.mxu0 %v3648_v44 }
0x1941   :  { %v2542_v48 = vpop.permute.xlu1 %2541 }
0x1943   :  { %v4248_v45 = vpop.eup %4247  ;;  %v2544_v52 = vpop.permute.xlu0 %2543 }
0x1944   :  { %v2291_v47 = vmul.f32 %v4248_v45, %v4244_v53  ;;  %v3650_v45 = vld [vmem:[%s5197_s12 + $0x30] sm:$0xff] }
0x1945   :  { %v4250_v46 = vpop.eup %4249  ;;  %v2835_v51 = vpop.permute.xlu1 %2834 }
0x1946   :  { %v2290_v19 = vmul.f32 %v4250_v46, %v4246_v32 }
0x1947   :  { %v2833_v58 = vpop.permute.xlu0 %2832 }
0x1948   :  { %4047 = vmatprep.mubr.msk.f32.mxu0 %vm504_vm3, %v2290_v19 }
0x1949   :  { %4048 = vmatmul.mubr.msk.f32.vlgmr.msra.gmra.mxu0 %vm504_vm3, %v2291_v47  ;;  %v2829_v56 = vpop.permute.xlu1 %2828 }
0x194a   :  { %4057 = vmatprep.mubr.msk.f32.mxu0 %vm416_vm2, %v2166_v12  ;;  %4056 = vmatpush3.msra.mxu0 %v3648_v44 }
0x194b   :  { %v2831_v59 = vpop.permute.xlu0 %2830 }
0x194d   :  { %4058 = vmatmul.mubr.msk.f32.vlgmr.msra.gmra.mxu0 %vm416_vm2, %v4955_v11 }
0x1a09   :  { %v4049_v49 = vpop.f32.mrf.mxu0 }
0x1a0b   :  { %v2370_v50 = vpop.f32.mrf.mxu0 }
0x1a0c   :  { %4052 = vmatprep.mubr.msk.f32.mxu1 %vm416_vm2, %v2370_v50 }
0x1a0d   :  { %4053 = vmatmul.mubr.msk.f32.vlgmr.msra.gmra.mxu1 %vm416_vm2, %v4049_v49  ;;  %v4059_v46 = vpop.f32.mrf.mxu0 }
0x1a0e   :  { %4061 = vmatpush3.xpose.msk.msra.mxu1 %vm416_vm2, %v2548_v43  ;;  %4064 = vmatprep.mubr.msk.f32.mxu1 %vm416_vm2, %v2542_v48 }
0x1a0f   :  { %4062 = vmatprep.subr.msk.mxu1 %vm416_vm2, %v2546_v15  ;;  %v2532_v19 = vpop.f32.mrf.mxu0 }
0x1a12   :  { %4063 = vmatpush3.xpose.msk.msra.mxu1 %vm416_vm2, %v2546_v15 }
0x1a13   :  { %4079 = vmatprep.subr.msk.mxu1 %vm416_vm2, %v2835_v51 }
0x1a15   :  { %4065 = vmatmul.mubr.msk.f32.vlgmr.msra.gmra.mxu1 %vm416_vm2, %v2544_v52 }
0x1a16   :  { %4080 = vmatpush3.xpose.msk.msra.mxu1 %vm416_vm2, %v2835_v51  ;;  %4083 = vmatprep.mubr.msk.f32.mxu1 %vm416_vm2, %v2829_v56 }
0x1a17   :  { %4081 = vmatprep.subr.msk.mxu1 %vm416_vm2, %v2833_v58 }
0x1a1a   :  { %4082 = vmatpush3.xpose.msk.msra.mxu1 %vm416_vm2, %v2833_v58  ;;  %v3651_v58 = vld [vmem:[%s5197_s12 + $0x38] sm:$0xff] }
0x1a1d   :  { %4084 = vmatmul.mubr.msk.f32.vlgmr.msra.gmra.mxu1 %vm416_vm2, %v2831_v59 }
0x1acd   :  { %v5018_v60 = vpop.f32.mrf.mxu1 }
0x1ace   :  { %v2538_v59 = vadd.f32 %v4059_v46, %v5018_v60  ;;  %v3714_v46 = vld [vmem:[%s5203_s18 + $0xf0] sm:$0xff] }
0x1acf   :  { %v5020_v62 = vpop.f32.mrf.mxu1 }
0x1ad5   :  { %v4066_v63 = vpop.f32.mrf.mxu1 }
0x1ad6   :  { %v2633_v61 = vmul.f32 0.35355338, %v4066_v63 }
0x1ad7   :  { %v2623_v2 = vpop.f32.mrf.mxu1 }
0x1ad8   :  { %v2632_v0 = vmul.f32 0.35355338, %v2623_v2  ;;  %v2635_v3 = vadd.f32 %v4960_v20, %v2633_v61  ;;  %v2533_v61 = vadd.f32 %v2532_v19, %v5020_v62  ;;  %v3713_v19 = vld [vmem:[%s5203_s18 + $0xe8] sm:$0xff] }
0x1ada   :  { %v2639_v4 = vsel %vm504_vm3, %v2635_v3, -inf  ;;  %v2634_v39 = vadd.f32 %v4967_v23, %v2632_v0 }
0x1adb   :  { %2640 = vmax.xlane.f32.xlu0 %v2639_v4 }
0x1adc   :  { %v2636_v7 = vsel %vm504_vm3, %v2634_v39, -inf }
0x1add   :  { %2637 = vmax.xlane.f32.xlu1 %v2636_v7  ;;  %v4085_v16 = vpop.f32.mrf.mxu1 }
0x1ade   :  { %v2920_v21 = vmul.f32 0.35355338, %v4085_v16 }
0x1adf   :  { %v2910_v17 = vpop.f32.mrf.mxu1 }
0x1ae0   :  { %v2919_v18 = vmul.f32 0.35355338, %v2910_v17  ;;  %v2922_v24 = vadd.f32 %v4960_v20, %v2920_v21 }
0x1ae2   :  { %v2921_v22 = vadd.f32 %v4967_v23, %v2919_v18  ;;  %v2926_v26 = vsel %vm504_vm3, %v2922_v24, -inf }
0x1ae4   :  { %v2923_v25 = vsel %vm504_vm3, %v2921_v22, -inf }
0x1b64   :  { %v2641_v41 = vpop.xlane.xlu0 %2640 }
0x1b65   :  { %v2643_v13 = vsub.f32 %v2635_v3, %v2641_v41 }
0x1b66   :  { %v2638_v9 = vpop.xlane.xlu1 %2637 }
0x1b67   :  { %v2646_v55 = vmul.f32 1.442695, %v2643_v13  ;;  %v2642_v10 = vsub.f32 %v2634_v39, %v2638_v9  ;;  %v3685_v13 = vld [vmem:[%s5198_s13 + $0x1] ss:$0 sm:$0xff] }
0x1b69   :  { %4251 = vpow2.f32 %v2646_v55  ;;  %v2644_v54 = vmul.f32 1.442695, %v2642_v10 }
0x1b6b   :  { %4253 = vpow2.f32 %v2644_v54 }
0x1b76   :  { %v4252_v6 = vpop.eup %4251 }
0x1b77   :  { %v2651_v11 = vsel %vm504_vm3, %v4252_v6, 0.0 }
0x1b78   :  { %v4254_v12 = vpop.eup %4253  ;;  %2652 = vadd.xlane.f32.xlu1 %v2651_v11 }
0x1b79   :  { %v2648_v14 = vsel %vm504_vm3, %v4254_v12, 0.0 }
0x1b7a   :  { %2649 = vadd.xlane.f32.xlu0 %v2648_v14 }
0x1b89   :  { %2658 = vrot.lane.b32.xlu1 %v4915_v42, %s5254_s0 }
0x1b90   :  { %2660 = vrot.lane.b32.xlu0 %v4913_v38, %s5254_s0 }
0x1bad   :  { %2924 = vmax.xlane.f32.xlu1 %v2923_v25  ;;  %v3693_v25 = vld [vmem:[%s5201_s16 + $0x38] sm:$0xff] }
0x1bae   :  { %4098 = vmatprep.subr.mxu1 %v3693_v25 }
0x1baf   :  { %2927 = vmax.xlane.f32.xlu0 %v2926_v26  ;;  %v3692_v26 = vld [vmem:[%s5201_s16 + $0x30] sm:$0xff]  ;;  %4099 = vmatpush3.msra.mxu1 %v3693_v25 }
0x1bb0   :  { %4100 = vmatprep.subr.mxu1 %v3692_v26 }
0x1bb1   :  { %4101 = vmatpush3.msra.mxu1 %v3692_v26 }
0x1c01   :  { %v2653_v27 = vpop.xlane.xlu1 %2652 }
0x1c02   :  { %4255 = vrcp.f32 %v2653_v27  ;;  %v3691_v27 = vld [vmem:[%s5201_s16 + $0x28] sm:$0xff] }
0x1c03   :  { %v2650_v28 = vpop.xlane.xlu0 %2649  ;;  %4102 = vmatprep.subr.mxu1 %v3691_v27 }
0x1c04   :  { %4257 = vrcp.f32 %v2650_v28  ;;  %v3690_v28 = vld [vmem:[%s5201_s16 + $0x20] sm:$0xff]  ;;  %4103 = vmatpush3.msra.mxu1 %v3691_v27 }
0x1c05   :  { %v2659_v29 = vpop.permute.xlu1 %2658  ;;  %4104 = vmatprep.subr.mxu1 %v3690_v28 }
0x1c06   :  { %4105 = vmatpush3.msra.mxu1 %v3690_v28 }
0x1c07   :  { %v2661_v57 = vpop.permute.xlu0 %2660  ;;  %4144 = vmatprep.subr.mxu1 %v4305_v1 }
0x1c08   :  { %4067 = vmatprep.subr.mxu0 %v2661_v57 }
0x1c09   :  { %4068 = vmatpush3.msra.mxu0 %v2661_v57 }
0x1c0a   :  { %4069 = vmatprep.subr.mxu0 %v2659_v29 }
0x1c0b   :  { %4070 = vmatpush3.msra.mxu0 %v2659_v29 }
0x1c0c   :  { %4074 = vmatprep.subr.mxu0 %v3650_v45 }
0x1c0f   :  { %v4256_v30 = vpop.eup %4255 }
0x1c10   :  { %v2657_v20 = vmul.f32 %v4256_v30, %v4252_v6 }
0x1c11   :  { %v4258_v23 = vpop.eup %4257 }
0x1c12   :  { %v2656_v53 = vmul.f32 %v4258_v23, %v4254_v12 }
0x1c14   :  { %4071 = vmatprep.mubr.msk.f32.mxu0 %vm504_vm3, %v2656_v53 }
0x1c15   :  { %4072 = vmatmul.mubr.msk.f32.vlgmr.msra.gmra.mxu0 %vm504_vm3, %v2657_v20 }
0x1c16   :  { %4075 = vmatpush3.msra.mxu0 %v3650_v45  ;;  %v3715_v45 = vld [vmem:[%s5203_s18 + $0xf8] sm:$0xff] }
0x1c36   :  { %v2925_v31 = vpop.xlane.xlu1 %2924 }
0x1c37   :  { %v2929_v32 = vsub.f32 %v2921_v22, %v2925_v31 }
0x1c38   :  { %v2928_v33 = vpop.xlane.xlu0 %2927 }
0x1c39   :  { %v2931_v34 = vmul.f32 1.442695, %v2929_v32  ;;  %v2930_v35 = vsub.f32 %v2922_v24, %v2928_v33  ;;  %v3688_v32 = vld [vmem:[%s5199_s14 + $0x1] ss:$0 sm:$0xff] }
0x1c3b   :  { %4259 = vpow2.f32 %v2931_v34  ;;  %v2933_v36 = vmul.f32 1.442695, %v2930_v35 }
0x1c3d   :  { %4261 = vpow2.f32 %v2933_v36 }
0x1c48   :  { %v4260_v37 = vpop.eup %4259 }
0x1c49   :  { %v2935_v40 = vsel %vm504_vm3, %v4260_v37, 0.0 }
0x1c4a   :  { %v4262_v43 = vpop.eup %4261  ;;  %2936 = vadd.xlane.f32.xlu0 %v2935_v40 }
0x1c4b   :  { %v2938_v44 = vsel %vm504_vm3, %v4262_v43, 0.0 }
0x1c4c   :  { %2939 = vadd.xlane.f32.xlu1 %v2938_v44 }
0x1c5d   :  { %2945 = vrot.lane.b32.xlu1 %v4915_v42, %s5255_s8 }
0x1c60   :  { %2947 = vrot.lane.b32.xlu0 %v4913_v38, %s5255_s8 }
0x1cd3   :  { %v2937_v47 = vpop.xlane.xlu0 %2936 }
0x1cd4   :  { %4263 = vrcp.f32 %v2937_v47  ;;  %v3712_v47 = vld [vmem:[%s5203_s18 + $0xe0] sm:$0xff] }
0x1cd5   :  { %v4073_v48 = vpop.f32.mrf.mxu0  ;;  %v2940_v49 = vpop.xlane.xlu1 %2939 }
0x1cd6   :  { %4265 = vrcp.f32 %v2940_v49  ;;  %v3710_v49 = vld [vmem:[%s5203_s18 + $0xd0] sm:$0xff] }
0x1cd7   :  { %v2736_v15 = vpop.f32.mrf.mxu0  ;;  %v2948_v50 = vpop.permute.xlu0 %2947 }
0x1cd8   :  { %4076 = vmatprep.mubr.msk.f32.mxu0 %vm416_vm2, %v2736_v15  ;;  %4086 = vmatprep.subr.mxu0 %v2948_v50  ;;  %v3709_v15 = vld [vmem:[%s5203_s18 + $0xc8] sm:$0xff] }
0x1cd9   :  { %4077 = vmatmul.mubr.msk.f32.vlgmr.msra.gmra.mxu0 %vm416_vm2, %v4073_v48  ;;  %v2946_v51 = vpop.permute.xlu1 %2945  ;;  %v3711_v48 = vld [vmem:[%s5203_s18 + $0xd8] sm:$0xff] }
0x1cda   :  { %4087 = vmatpush3.msra.mxu0 %v2948_v50  ;;  %v3708_v50 = vld [vmem:[%s5203_s18 + $0xc0] sm:$0xff] }
0x1cdb   :  { %4088 = vmatprep.subr.mxu0 %v2946_v51 }
0x1cdc   :  { %4089 = vmatpush3.msra.mxu0 %v2946_v51  ;;  %v3707_v51 = vld [vmem:[%s5203_s18 + $0xb8] sm:$0xff] }
0x1cdd   :  { %4093 = vmatprep.subr.mxu0 %v3651_v58 }
0x1ce1   :  { %v4264_v42 = vpop.eup %4263 }
0x1ce2   :  { %v2943_v38 = vmul.f32 %v4264_v42, %v4260_v37  ;;  %v3689_v37 = vld [vmem:[%s5200_s15 + $0x1] ss:$0 sm:$0xff]  ;;  %v3706_v42 = vld [vmem:[%s5203_s18 + $0xb0] sm:$0xff] }
0x1ce3   :  { %v4266_v52 = vpop.eup %4265 }
0x1ce4   :  { %4090 = vmatprep.mubr.msk.f32.mxu0 %vm504_vm3, %v2943_v38  ;;  %v2944_v56 = vmul.f32 %v4266_v52, %v4262_v43  ;;  %v3705_v38 = vld [vmem:[%s5203_s18 + $0xa8] sm:$0xff]  ;;  %v3704_v52 = vld [vmem:[%s5203_s18 + $0xa0] sm:$0xff] }
0x1ce6   :  { %4091 = vmatmul.mubr.msk.f32.vlgmr.msra.gmra.mxu0 %vm504_vm3, %v2944_v56  ;;  %v3703_v56 = vld [vmem:[%s5203_s18 + $0x98] sm:$0xff] }
0x1ce7   :  { %4094 = vmatpush3.msra.mxu0 %v3651_v58  ;;  %v3702_v58 = vld [vmem:[%s5203_s18 + $0x90] sm:$0xff] }
0x1ce8   :  { %4109 = vmatprep.subr.mxu0 %v3715_v45 }
0x1d99   :  { %v4078_v63 = vpop.f32.mrf.mxu0 }
0x1d9a   :  { %v2827_v2 = vadd.f32 %v4078_v63, %v2538_v59  ;;  %v3701_v59 = vld [vmem:[%s5203_s18 + $0x88] sm:$0xff]  ;;  %v3700_v63 = vld [vmem:[%s5203_s18 + $0x80] sm:$0xff] }
0x1d9b   :  { %v2817_v0 = vpop.f32.mrf.mxu0 }
0x1d9c   :  { %v2826_v3 = vadd.f32 %v2817_v0, %v2533_v61  ;;  %v3695_v61 = vld [vmem:[%s5202_s17 + $0x1] ss:$0 sm:$0xff] }
0x1da6   :  { %v4092_v4 = vpop.f32.mrf.mxu0 }
0x1da8   :  { %v3023_v39 = vpop.f32.mrf.mxu0 }
0x1da9   :  { %4095 = vmatprep.mubr.msk.f32.mxu0 %vm416_vm2, %v3023_v39 }
0x1daa   :  { %4096 = vmatmul.mubr.msk.f32.vlgmr.msra.gmra.mxu0 %vm416_vm2, %v4092_v4 }
0x1dab   :  { %4110 = vmatpush3.msra.mxu0 %v3715_v45 }
0x1dac   :  { %4111 = vmatprep.subr.mxu0 %v3714_v46 }
0x1dad   :  { %4112 = vmatpush3.msra.mxu0 %v3714_v46 }
0x1dae   :  { %4113 = vmatprep.subr.mxu0 %v3713_v19 }
0x1daf   :  { %4114 = vmatpush3.msra.mxu0 %v3713_v19 }
0x1db0   :  { %4115 = vmatprep.subr.mxu0 %v3712_v47 }
0x1db1   :  { %4116 = vmatpush3.msra.mxu0 %v3712_v47 }
0x1db2   :  { %4117 = vmatprep.subr.mxu0 %v3711_v48 }
0x1db3   :  { %4118 = vmatpush3.msra.mxu0 %v3711_v48 }
0x1db4   :  { %4119 = vmatprep.subr.mxu0 %v3710_v49 }
0x1db5   :  { %4120 = vmatpush3.msra.mxu0 %v3710_v49 }
0x1db6   :  { %4121 = vmatprep.subr.mxu0 %v3709_v15 }
0x1db7   :  { %4122 = vmatpush3.msra.mxu0 %v3709_v15 }
0x1db8   :  { %4123 = vmatprep.subr.mxu0 %v3708_v50 }
0x1db9   :  { %4124 = vmatpush3.msra.mxu0 %v3708_v50 }
0x1dba   :  { %4125 = vmatprep.subr.mxu0 %v3707_v51 }
0x1dbb   :  { %4126 = vmatpush3.msra.mxu0 %v3707_v51 }
0x1dbc   :  { %4127 = vmatprep.subr.mxu0 %v3706_v42 }
0x1dbd   :  { %4128 = vmatpush3.msra.mxu0 %v3706_v42 }
0x1dbe   :  { %4129 = vmatprep.subr.mxu0 %v3705_v38 }
0x1dbf   :  { %4130 = vmatpush3.msra.mxu0 %v3705_v38 }
0x1dc0   :  { %4131 = vmatprep.subr.mxu0 %v3704_v52 }
0x1dc1   :  { %4132 = vmatpush3.msra.mxu0 %v3704_v52 }
0x1dc2   :  { %4133 = vmatprep.subr.mxu0 %v3703_v56 }
0x1dc3   :  { %4134 = vmatpush3.msra.mxu0 %v3703_v56 }
0x1dc4   :  { %4135 = vmatprep.subr.mxu0 %v3702_v58 }
0x1dc5   :  { %4136 = vmatpush3.msra.mxu0 %v3702_v58 }
0x1dc6   :  { %4137 = vmatprep.subr.mxu0 %v3701_v59 }
0x1dc7   :  { %4138 = vmatpush3.msra.mxu0 %v3701_v59 }
0x1dc8   :  { %4139 = vmatprep.subr.mxu0 %v3700_v63 }
0x1dc9   :  { %4140 = vmatpush3.msra.mxu0 %v3700_v63 }
0x1e6a   :  { %v4097_v7 = vpop.f32.mrf.mxu0 }
0x1e6b   :  { %v3114_v41 = vadd.f32 %v4097_v7, %v2827_v2 }
0x1e6c   :  { %v3104_v9 = vpop.f32.mrf.mxu0 }
0x1e6d   :  { %v3116_v60 = vadd.f32 %v3114_v41, %v4878_v5  ;;  %v3113_v55 = vadd.f32 %v3104_v9, %v2826_v3 }
0x1e6f   :  { %v5062_v62 = vadd.f32 %v3685_v13, %v3116_v60  ;;  %v3115_v10 = vadd.f32 %v3113_v55, %v4882_v8 }
0x1e71   :  { %v5065_v54 = vadd.f32 %v3685_v13, %v3115_v10  ;;  %v3134_v6 = vsel %vm192_vm1, %v5062_v62, 0.0 }
0x1e72   :  { %3135 = vadd.xlane.f32.xlu0 %v3134_v6 }
0x1e73   :  { %v3131_v11 = vsel %vm192_vm1, %v5065_v54, 0.0 }
0x1e74   :  { %3132 = vadd.xlane.f32.xlu1 %v3131_v11 }
0x1efb   :  { %v3136_v12 = vpop.xlane.xlu0 %3135 }
0x1efc   :  { %v3138_v14 = vmul.f32 0.03125, %v3136_v12 }
0x1efd   :  { %v3133_v16 = vpop.xlane.xlu1 %3132 }
0x1efe   :  { %v3140_v5 = vsub.f32 %v5062_v62, %v3138_v14  ;;  %v3137_v17 = vmul.f32 0.03125, %v3133_v16 }
0x1f00   :  { %v3139_v18 = vsub.f32 %v5065_v54, %v3137_v17  ;;  %v3142_v21 = vmul.f32 %v3140_v5, %v3140_v5 }
0x1f02   :  { %v3146_v8 = vsel %vm192_vm1, %v3142_v21, 0.0  ;;  %v3141_v22 = vmul.f32 %v3139_v18, %v3139_v18 }
0x1f03   :  { %3147 = vadd.xlane.f32.xlu1 %v3146_v8 }
0x1f04   :  { %v3143_v24 = vsel %vm192_vm1, %v3141_v22, 0.0 }
0x1f05   :  { %3144 = vadd.xlane.f32.xlu0 %v3143_v24  ;;  %v3387_v24 = vld [vmem:[%s5207_s22] sm:$0x3] }
0x1f8c   :  { %v3148_v57 = vpop.xlane.xlu1 %3147 }
0x1f8d   :  { %v3150_v29 = vmul.f32 0.03125, %v3148_v57 }
0x1f8e   :  { %v3145_v30 = vpop.xlane.xlu0 %3144 }
0x1f8f   :  { %v3152_v23 = vadd.f32 1e-05, %v3150_v29  ;;  %v3149_v53 = vmul.f32 0.03125, %v3145_v30  ;;  %v3494_v30 = vld [vmem:[%s5208_s23 + $0x18] sm:$0xff] }
0x1f91   :  { %4267 = vrsqrt.f32 %v3152_v23  ;;  %v3151_v20 = vadd.f32 1e-05, %v3149_v53  ;;  %v3493_v23 = vld [vmem:[%s5208_s23 + $0x10] sm:$0xff]  ;;  %v3492_v53 = vld [vmem:[%s5208_s23 + $0x8] sm:$0xff] }
0x1f93   :  { %4269 = vrsqrt.f32 %v3151_v20  ;;  %v3491_v20 = vld [vmem:[%s5208_s23] sm:$0xff]  ;;  %s4319_s23 = smov [#allocation2]  }
0x1f94   :  { %s3576_s7 = sshll.u32 %s4319_s23, 4  ;;  %s3577_s7 = int_to_ptr.vmem [resolvable:$true] %s3576_s7 }
0x1f95   :  { %s4283_s0 = scalar_lea.vmem %s3577_s7, 32  ;;  %p4288_p1 = scmp.lt.s32.totalorder %s3577_s7, %s3577_s7 }
0x1f96   :  { %p4284_p0 = scmp.ne.s32.totalorder %s3577_s7, %s4283_s0  ;;  %p4289_p2 = scmp.lt.s32.totalorder %s4283_s0, %s4283_s0 }
0x1f98   :  { %p4290_p3 = por %p4289_p2, %p4288_p1 }
0x1f9a   :  { %p4291_p4 = pnand %p4290_p3, %p4284_p0 }
0x1f9e   :  { %v4268_v31 = vpop.eup %4267 }
0x1f9f   :  { %v3156_v33 = vmul.f32 %v4268_v31, %v3140_v5  ;;  %v3717_v5 = vld [vmem:[%s5204_s19 + $0x1] ss:$0 sm:$0xff] }
0x1fa0   :  { %v4270_v34 = vpop.eup %4269 }
0x1fa1   :  { %v3155_v35 = vmul.f32 %v4270_v34, %v3139_v18  ;;  %v3164_v36 = vmul.f32 %v3688_v32, %v3156_v33 }
0x1fa3   :  { %v3163_v40 = vmul.f32 %v3688_v32, %v3155_v35  ;;  %v3172_v44 = vadd.f32 %v3689_v37, %v3164_v36  ;;  %v3719_v35 = vld [vmem:[%s5205_s20] ss:$0 sm:$0xff] }
0x1fa5   :  { %v3171_v43 = vadd.f32 %v3689_v37, %v3163_v40  ;;  %v3720_v37 = vld [vmem:[%s5206_s21] ss:$0 sm:$0xff] }
0x1fa7   :  { %4106 = vmatprep.mubr.msk.f32.mxu1 %vm192_vm1, %v3171_v43 }
0x1fa8   :  { %4107 = vmatmul.mubr.msk.f32.vlgmr.msra.gmra.mxu1 %vm192_vm1, %v3172_v44 }
0x1fa9   :  { %4148 = vmatprep.mubr.msk.f32.mxu1 %vm4318_vm4, %v4305_v1 }
0x2068   :  { %v4108_v2 = vpop.f32.mrf.mxu1 }
0x2069   :  { %v3264_v0 = vadd.f32 %v4108_v2, %v3695_v61 }
0x206a   :  { %v3258_v3 = vpop.f32.mrf.mxu1 }
0x206b   :  { %v3699_v4 = vmul.f32 -1.702, %v3264_v0  ;;  %v3259_v39 = vadd.f32 %v3695_v61, %v3258_v3 }
0x206d   :  { %v3273_v7 = vmul.f32 1.442695, %v3699_v4  ;;  %v3698_v41 = vmul.f32 -1.702, %v3259_v39 }
0x206f   :  { %4271 = vpow2.f32 %v3273_v7  ;;  %v3271_v13 = vmul.f32 1.442695, %v3698_v41 }
0x2071   :  { %4273 = vpow2.f32 %v3271_v13 }
0x207c   :  { %v4272_v9 = vpop.eup %4271 }
0x207d   :  { %v3276_v60 = vadd.f32 1.0, %v4272_v9 }
0x207e   :  { %v4274_v55 = vpop.eup %4273 }
0x207f   :  { %v3275_v10 = vadd.f32 1.0, %v4274_v55  ;;  %4275 = vrcp.f32 %v3276_v60 }
0x2081   :  { %4277 = vrcp.f32 %v3275_v10 }
0x208c   :  { %v4276_v6 = vpop.eup %4275 }
0x208d   :  { %v3282_v14 = vmul.f32 %v4276_v6, %v3264_v0 }
0x208e   :  { %v4278_v11 = vpop.eup %4277 }
0x208f   :  { %v3281_v12 = vmul.f32 %v4278_v11, %v3259_v39 }
0x2091   :  { %4141 = vmatprep.mubr.f32.mxu0 %v3281_v12 }
0x2092   :  { %4142 = vmatmul.mubr.f32.vlgmr.msra.gmra.mxu0 %v3282_v14 }
0x2152   :  { %v4143_v16 = vpop.f32.mrf.mxu0 }
0x2153   :  { %v3376_v17 = vadd.f32 %v4143_v16, %v5062_v62 }
0x2154   :  { %v3366_v18 = vpop.f32.mrf.mxu0 }
0x2155   :  { %v3386_v21 = vadd.f32 %v3717_v5, %v3376_v17  ;;  %v3375_v8 = vadd.f32 %v3366_v18, %v5065_v54 }
0x2157   :  { %v3385_v22 = vadd.f32 %v3717_v5, %v3375_v8  ;;  %4145 = vmatpush3.msra.mxu1 %v3386_v21 }
0x2158   :  { %4146 = vmatprep.subr.mxu1 %v4305_v1 }
0x2159   :  { %4147 = vmatpush3.msra.mxu1 %v3385_v22 }
0x215a   :  { %4149 = vmatmul.mubr.msk.f32.vlgmr.msra.gmra.mxu1 %vm504_vm3, %v3387_v24  ;;  %4151 = vmatprep.subr.mxu1 %v4305_v1 }
0x215b   :  { %4159 = vmatprep.mubr.msk.f32.mxu1 %vm4318_vm4, %v4305_v1  ;;  %4152 = vmatpush3.msra.mxu1 %v3494_v30 }
0x215c   :  { %4153 = vmatprep.subr.mxu1 %v4305_v1 }
0x215d   :  { %4154 = vmatpush3.msra.mxu1 %v3493_v23 }
0x215e   :  { %4155 = vmatprep.subr.mxu1 %v4305_v1 }
0x215f   :  { %4156 = vmatpush3.msra.mxu1 %v3492_v53 }
0x2160   :  { %4157 = vmatprep.subr.mxu1 %v4305_v1 }
0x2161   :  { %4158 = vmatpush3.msra.mxu1 %v3491_v20 }
0x221a   :  { %v3457_v62 = vpop.f32.mrf.mxu1 }
0x221b   :  { %v3464_v25 = vsel %vm3463_vm5, %v3457_v62, 0.0 }
0x221c   :  { %3465 = vadd.xlane.f32.xlu0 %v3464_v25  ;;  %v4150_v54 = vpop.f32.mrf.mxu1 }
0x22a5   :  { %v3466_v26 = vpop.xlane.xlu0 %3465 }
0x22a6   :  { %v3467_v27 = vmul.f32 0.03125, %v3466_v26 }
0x22a8   :  { %v3468_v28 = vsub.f32 %v3457_v62, %v3467_v27 }
0x22aa   :  { %v3469_v57 = vmul.f32 %v3468_v28, %v3468_v28 }
0x22ac   :  { %v3470_v29 = vsel %vm3463_vm5, %v3469_v57, 0.0 }
0x22ad   :  { %3471 = vadd.xlane.f32.xlu1 %v3470_v29 }
0x2336   :  { %v3472_v31 = vpop.xlane.xlu1 %3471 }
0x2337   :  { %v3473_v32 = vmul.f32 0.03125, %v3472_v31 }
0x2339   :  { %v3474_v33 = vadd.f32 1e-05, %v3473_v32 }
0x233b   :  { %4279 = vrsqrt.f32 %v3474_v33 }
0x2348   :  { %v4280_v34 = vpop.eup %4279 }
0x2349   :  { %v3476_v36 = vmul.f32 %v4280_v34, %v3468_v28 }
0x234b   :  { %v3483_v40 = vmul.f32 %v3719_v35, %v3476_v36 }
0x234d   :  { %v3490_v43 = vadd.f32 %v3720_v37, %v3483_v40 }
0x234f   :  { %4160 = vmatmul.mubr.msk.f32.vlgmr.msra.gmra.mxu1 %vm192_vm1, %v3490_v43 }
0x240f   :  { %v3564_v1 = vpop.f32.mrf.mxu1 }
0x2410   :  { %3569 = vst.msk [vmem:[#allocation2] sm:$0x3] %vm3568_vm6, %v3564_v1 }
0x2411   :  { %v4161_v44 = vpop.f32.mrf.mxu1 }
0x2412   :  { %4294 = shalt.err (!%p4291_p4)
}
0x2413   :  { %3579 = dma.vmem_to_hbm [thread:$0]  %s3577_s7, 32, %s5209_s24, [#allocation3]  }
0x2414   :  { %4303 = dma.done.wait [#allocation3], 32  }
0x2415   :  { %4304 = vsyncadd [#allocation3], 4294967264 }
0x2416   :  { %3583 = vsyncpa [#allocation3], 1 }

</bundles_post_ra>
